<compile_context>
chip_gen: v6e
topology: v6e:2x2x1
jax: 0.10.0
libtpu: 0.0.40
codegen_flags: <defaults>
</compile_context>

<pallas_src>
import functools
import math

import jax
import jax.numpy as jnp
from jax.experimental import pallas as pl
from jax.experimental.pallas import tpu as pltpu


def _layernorm(x, gamma, beta, eps=1e-5):
    mu = jnp.mean(x, axis=-1, keepdims=True)
    var = jnp.mean((x - mu) ** 2, axis=-1, keepdims=True)
    return (x - mu) * jax.lax.rsqrt(var + eps) * gamma + beta


def multiblock_kernel(
    x_ref, bias_ref,
    wqkv_ref, bqkv_ref, wo_ref, bo_ref,
    ln1_g_ref, ln1_b_ref,
    w1_ref, b1_ref, w2_ref, b2_ref,
    ln2_g_ref, ln2_b_ref,
    out_ref,
    acc_ref,                      # VMEM scratch: (Bt*S, H) f32 resident activation
    *, num_head,
):
    l = pl.program_id(1)
    Bt, S, H = x_ref.shape
    nh = num_head
    hd = H // nh
    M = Bt * S
    bf16 = jnp.bfloat16

    # Load the input activation into the resident f32 buffer at layer 0 only.
    @pl.when(l == 0)
    def _():
        acc_ref[...] = x_ref[...].reshape(M, H)

    x = acc_ref[...]                                   # (M, H) f32
    xb = x.astype(bf16)

    # ---- fused QKV projection: one full-width GEMM ------------------------
    # (1/sqrt(hd) already folded into the Q columns / Q bias at prep time.)
    qkv = jnp.dot(xb, wqkv_ref[0],
                  preferred_element_type=jnp.float32) + bqkv_ref[0]   # (M, 3H)
    q = qkv[:, 0 * H:1 * H]
    k = qkv[:, 1 * H:2 * H]
    v = qkv[:, 2 * H:3 * H]

    # ---- per-batch-element attention (heads batched in one einsum) --------
    heads = []
    for b in range(Bt):                                # static unroll (Bt small)
        sl = slice(b * S, (b + 1) * S)
        qb = q[sl].reshape(S, nh, hd).transpose(1, 0, 2).astype(bf16)  # (nh,S,hd)
        kb = k[sl].reshape(S, nh, hd).transpose(1, 0, 2).astype(bf16)
        vb = v[sl].reshape(S, nh, hd).transpose(1, 0, 2).astype(bf16)

        s = jnp.einsum('hqd,hkd->hqk', qb, kb,
                       preferred_element_type=jnp.float32)             # (nh,S,S)
        s = s + bias_ref[b]                            # precomputed 0 / -1e9 bias

        # explicit softmax: max-subtract / exp / EUP reciprocal
        m = jnp.max(s, axis=-1, keepdims=True)
        p = jnp.exp(s - m)
        denom = jnp.sum(p, axis=-1, keepdims=True)
        p = p * pl.reciprocal(denom, approx=True)

        ob = jnp.einsum('hqk,hkd->hqd', p.astype(bf16), vb,
                        preferred_element_type=jnp.float32)            # (nh,S,hd)
        heads.append(jnp.transpose(ob, (1, 0, 2)).reshape(S, H))       # concat heads

    attn_in = heads[0] if Bt == 1 else jnp.concatenate(heads, axis=0)  # (M, H) f32

    # ---- output projection: single full-depth GEMM (K = H) ----------------
    attn = jnp.dot(attn_in.astype(bf16), wo_ref[0],
                   preferred_element_type=jnp.float32) + bo_ref[0]     # (M, H)

    # residual + LayerNorm1 (dropout1 == identity in eval)
    y = _layernorm(x + attn, ln1_g_ref[0], ln1_b_ref[0])

    # ---- FFN ---------------------------------------------------------------
    h1 = jnp.dot(y.astype(bf16), w1_ref[0],
                 preferred_element_type=jnp.float32) + b1_ref[0]
    h1 = jnp.maximum(h1, 0.0)                                          # ReLU
    ffn = jnp.dot(h1.astype(bf16), w2_ref[0],
                  preferred_element_type=jnp.float32) + b2_ref[0]

    # residual + LayerNorm2 (dropout2 == identity in eval)
    out = _layernorm(y + ffn, ln2_g_ref[0], ln2_b_ref[0])
    acc_ref[...] = out                                 # feed next layer

    # Writeback only once per batch block, on the last layer.
    @pl.when(l == pl.num_programs(1) - 1)
    def _():
        out_ref[...] = out.reshape(Bt, S, H).astype(out_ref.dtype)


def _stacked_spec(param_shape):
    """Block over one layer's slice of an L-stacked parameter."""
    nd = len(param_shape)
    return pl.BlockSpec((1,) + tuple(param_shape),
                        lambda b, l, _nd=nd: (l,) + (0,) * _nd)


def _vmem_limit_bytes(Bt, S, H, inner, nh):
    """Budget scoped VMEM from the actual footprint, capped by device VMEM."""
    bf16, f32 = 2, 4
    w_layer = (3 * H * H + H * H + H * inner + inner * H) * bf16   # matmul weights
    v_layer = (3 * H + H + inner + 5 * H) * f32                    # biases + LN rows
    weights = 2 * (w_layer + v_layer)                              # double-buffered over l
    act = Bt * S * H * f32                                         # resident scratch
    io = 2 * (2 * Bt * S * H * f32 + Bt * S * f32)                 # x/out/bias blocks
    attn = 2 * nh * S * S * f32 + Bt * S * 3 * H * (f32 + bf16)    # scores/probs/qkv
    ffn = Bt * S * inner * (f32 + bf16)
    est = weights + act + io + attn + ffn
    try:
        cap = int(pltpu.get_tpu_info().vmem_capacity_bytes)        # 64 MiB on v7x, 128 on v5e/v6e
    except Exception:
        cap = 64 << 20
    return int(min(max(2 * est, 32 << 20), 100 << 20, cap - (8 << 20)))


def multiblock(x, total_mask, stacked_params, num_head, *, batch_block=1):
    B, S, H = x.shape
    L = stacked_params[0].shape[0]
    Bt = batch_block
    assert B % Bt == 0, "batch_block must divide batch size"
    inner = stacked_params[6].shape[-1]                # w1: (L, H, inner)

    # Precompute the additive attention mask bias once (0 keep / -1e9 masked).
    mask_bias = jnp.where(total_mask > 0, 0.0, -1e9).astype(jnp.float32)  # (B,1,S)

    in_specs = [
        pl.BlockSpec((Bt, S, H), lambda b, l: (b, 0, 0)),   # x (fetched once / b-block)
        pl.BlockSpec((Bt, 1, S), lambda b, l: (b, 0, 0)),   # mask bias
    ] + [_stacked_spec(p.shape[1:]) for p in stacked_params]

    kernel = functools.partial(multiblock_kernel, num_head=num_head)
    return pl.pallas_call(
        kernel,
        out_shape=jax.ShapeDtypeStruct((B, S, H), x.dtype),
        grid_spec=pltpu.PrefetchScalarGridSpec(
            num_scalar_prefetch=0,
            grid=(B // Bt, L),                         # L innermost (sequential)
            in_specs=in_specs,
            out_specs=pl.BlockSpec((Bt, S, H), lambda b, l: (b, 0, 0)),
            scratch_shapes=[pltpu.VMEM((Bt * S, H), jnp.float32)],
        ),
        compiler_params=pltpu.CompilerParams(
            dimension_semantics=("parallel", "arbitrary"),
            vmem_limit_bytes=_vmem_limit_bytes(Bt, S, H, inner, num_head),
        ),
    )(x, mask_bias, *stacked_params)


# ---------------------------------------------------------------------------
# Parameter construction / layout preparation
# ---------------------------------------------------------------------------
def init_raw_layer_params(key, hidden_dim, inner_dim):
    """PyTorch-style params: (in, out) weight matrices, 1-D biases / LN params."""
    ks = jax.random.split(key, 6)
    w_scale = 0.02
    f32 = jnp.float32
    wq = w_scale * jax.random.normal(ks[0], (hidden_dim, hidden_dim), f32)
    wk = w_scale * jax.random.normal(ks[1], (hidden_dim, hidden_dim), f32)
    wv = w_scale * jax.random.normal(ks[2], (hidden_dim, hidden_dim), f32)
    wo = w_scale * jax.random.normal(ks[3], (hidden_dim, hidden_dim), f32)
    w1 = w_scale * jax.random.normal(ks[4], (hidden_dim, inner_dim), f32)
    w2 = w_scale * jax.random.normal(ks[5], (inner_dim, hidden_dim), f32)
    zH = jnp.zeros((hidden_dim,), f32)
    zI = jnp.zeros((inner_dim,), f32)
    oH = jnp.ones((hidden_dim,), f32)
    return [wq, zH, wk, zH, wv, zH, wo, zH,      # MHA
            oH, zH,                              # LayerNorm1 (gamma, beta)
            w1, zI, w2, zH,                      # FFN
            oH, zH]                              # LayerNorm2 (gamma, beta)


def prepare_layer_params(raw, num_head):
    """Fused bf16 matmul layouts + lane-dense (1, N) f32 rows.

    * wq/wk/wv fused into a single (H, 3H) matrix, 1/sqrt(hd) folded into the
      Q columns and Q bias.
    * biases / LayerNorm params stored as (1, N) lane-dense rows.
    """
    (wq, bq, wk, bk, wv, bv, wo, bo,
     ln1_g, ln1_b, w1, b1, w2, b2, ln2_g, ln2_b) = raw
    H = wq.shape[0]
    hd = H // num_head
    scale = 1.0 / math.sqrt(hd)
    bf16, f32 = jnp.bfloat16, jnp.float32

    def row(v):
        return v.reshape(1, -1).astype(f32)

    wqkv = jnp.concatenate([wq * scale, wk, wv], axis=1).astype(bf16)        # (H, 3H)
    bqkv = jnp.concatenate([bq * scale, bk, bv]).reshape(1, -1).astype(f32)  # (1, 3H)

    return [
        wqkv, bqkv,
        wo.astype(bf16), row(bo),
        row(ln1_g), row(ln1_b),
        w1.astype(bf16), row(b1),
        w2.astype(bf16), row(b2),
        row(ln2_g), row(ln2_b),
    ]


def multiblock_forward(x, total_mask, per_layer_raw, num_head, *, batch_block=1):
    per_layer = [prepare_layer_params(raw, num_head) for raw in per_layer_raw]
    stacked = [jnp.stack([layer[i] for layer in per_layer])
               for i in range(len(per_layer[0]))]
    return multiblock(x, total_mask, stacked, num_head, batch_block=batch_block)


if __name__ == "__main__":
    # Small shapes consistent with the module's structure.
    B, S = 2, 8
    hidden_dim, num_head, inner_dim, n_layers = 32, 4, 64, 2

    key = jax.random.PRNGKey(0)
    k_x, k_p = jax.random.split(key)

    x = jax.random.normal(k_x, (B, S, hidden_dim), jnp.float32)
    # total_mask: 1 for valid key positions, 0 for masked-out (last 2 tokens
    # of batch element 1 are masked).
    total_mask = jnp.ones((B, 1, S), jnp.float32)
    total_mask = total_mask.at[1, 0, -2:].set(0.0)

    layer_keys = jax.random.split(k_p, n_layers)
    per_layer_raw = [init_raw_layer_params(layer_keys[i], hidden_dim, inner_dim)
                     for i in range(n_layers)]

    # batch_block=2: whole batch per grid step -> per-layer weights streamed
    # from HBM once per step.  (On v7x, pick batch_block so B/Bt >= 2.)
    out = multiblock_forward(x, total_mask, per_layer_raw, num_head, batch_block=2)
    jax.block_until_ready(out)
    assert out.shape == (B, S, hidden_dim)
    assert bool(jnp.all(jnp.isfinite(out)))
    print("KERNEL_OK")
</pallas_src>

<mosaic_0001>
module attributes {stable_mosaic.version = 11 : i64} {
  func.func @multiblock_kernel(%arg0: i32, %arg1: i32, %arg2: memref<2x8x32xf32, #tpu.memory_space<vmem>>, %arg3: memref<2x1x8xf32, #tpu.memory_space<vmem>>, %arg4: memref<1x32x96xbf16, #tpu.memory_space<vmem>>, %arg5: memref<1x1x96xf32, #tpu.memory_space<vmem>>, %arg6: memref<1x32x32xbf16, #tpu.memory_space<vmem>>, %arg7: memref<1x1x32xf32, #tpu.memory_space<vmem>>, %arg8: memref<1x1x32xf32, #tpu.memory_space<vmem>>, %arg9: memref<1x1x32xf32, #tpu.memory_space<vmem>>, %arg10: memref<1x32x64xbf16, #tpu.memory_space<vmem>>, %arg11: memref<1x1x64xf32, #tpu.memory_space<vmem>>, %arg12: memref<1x64x32xbf16, #tpu.memory_space<vmem>>, %arg13: memref<1x1x32xf32, #tpu.memory_space<vmem>>, %arg14: memref<1x1x32xf32, #tpu.memory_space<vmem>>, %arg15: memref<1x1x32xf32, #tpu.memory_space<vmem>>, %arg16: memref<2x8x32xf32, #tpu.memory_space<vmem>>, %arg17: memref<16x32xf32, #tpu.memory_space<vmem>>) attributes {dimension_semantics = [#tpu.dimension_semantics<parallel>, #tpu.dimension_semantics<arbitrary>], iteration_bounds = array<i64: 1, 2>, scalar_prefetch = 0 : i64, scratch_operands = 1 : i64, tpu.core_type = #tpu.core_type<tc>, window_params = [{transform_indices = @transform_0, window_bounds = array<i64: 2, 8, 32>}, {transform_indices = @transform_1, window_bounds = array<i64: 2, 1, 8>}, {transform_indices = @transform_2, window_bounds = array<i64: 1, 32, 96>}, {transform_indices = @transform_3, window_bounds = array<i64: 1, 1, 96>}, {transform_indices = @transform_4, window_bounds = array<i64: 1, 32, 32>}, {transform_indices = @transform_5, window_bounds = array<i64: 1, 1, 32>}, {transform_indices = @transform_6, window_bounds = array<i64: 1, 1, 32>}, {transform_indices = @transform_7, window_bounds = array<i64: 1, 1, 32>}, {transform_indices = @transform_8, window_bounds = array<i64: 1, 32, 64>}, {transform_indices = @transform_9, window_bounds = array<i64: 1, 1, 64>}, {transform_indices = @transform_10, window_bounds = array<i64: 1, 64, 32>}, {transform_indices = @transform_11, window_bounds = array<i64: 1, 1, 32>}, {transform_indices = @transform_12, window_bounds = array<i64: 1, 1, 32>}, {transform_indices = @transform_13, window_bounds = array<i64: 1, 1, 32>}, {transform_indices = @transform_14, window_bounds = array<i64: 2, 8, 32>}]} {
    %c0_i32 = arith.constant 0 : i32
    %0 = arith.cmpi eq, %arg1, %c0_i32 : i32
    %1 = arith.extui %0 : i1 to i32
    %c0_i32_0 = arith.constant 0 : i32
    %2 = arith.cmpi ne, %1, %c0_i32_0 : i32
    scf.if %2 {
      %c0_68 = arith.constant 0 : index
      %c0_69 = arith.constant 0 : index
      %c0_70 = arith.constant 0 : index
      %164 = vector.load %arg2[%c0_68, %c0_69, %c0_70] : memref<2x8x32xf32, #tpu.memory_space<vmem>>, vector<2x8x32xf32>
      %165 = vector.shape_cast %164 : vector<2x8x32xf32> to vector<16x32xf32>
      %c0_71 = arith.constant 0 : index
      %c0_72 = arith.constant 0 : index
      %166 = vector.load %arg17[%c0_71, %c0_72] : memref<16x32xf32, #tpu.memory_space<vmem>>, vector<16x32xf32>
      tpu.vector_store %arg17[%c0_71, %c0_72], %165 {strides = array<i32>} : memref<16x32xf32, #tpu.memory_space<vmem>>, vector<16x32xf32>,
    } else {
    }
    %c0 = arith.constant 0 : index
    %c0_1 = arith.constant 0 : index
    %3 = vector.load %arg17[%c0, %c0_1] : memref<16x32xf32, #tpu.memory_space<vmem>>, vector<16x32xf32>
    %4 = arith.truncf %3 : vector<16x32xf32> to vector<16x32xbf16>
    %c0_2 = arith.constant 0 : index
    %c0_3 = arith.constant 0 : index
    %c0_4 = arith.constant 0 : index
    %5 = vector.load %arg4[%c0_2, %c0_3, %c0_4] : memref<1x32x96xbf16, #tpu.memory_space<vmem>>, vector<1x32x96xbf16>
    %6 = vector.shape_cast %5 : vector<1x32x96xbf16> to vector<32x96xbf16>
    %cst = arith.constant dense<0.000000e+00> : vector<16x96xf32>
    %7 = tpu.matmul %4, %6, %cst {dimension_numbers = #tpu.dot_dimension_numbers<[1], [0], [0], [1], [0, 0, 1, 1], [], []>} : vector<16x32xbf16>, vector<32x96xbf16>, vector<16x96xf32> -> vector<16x96xf32>
    %c0_5 = arith.constant 0 : index
    %c0_6 = arith.constant 0 : index
    %c0_7 = arith.constant 0 : index
    %8 = vector.load %arg5[%c0_5, %c0_6, %c0_7] : memref<1x1x96xf32, #tpu.memory_space<vmem>>, vector<1x1x96xf32>
    %9 = vector.shape_cast %8 : vector<1x1x96xf32> to vector<1x96xf32>
    %10 = vector.broadcast %9 : vector<1x96xf32> to vector<16x96xf32>
    %11 = arith.addf %7, %10 : vector<16x96xf32>
    %12 = vector.extract_strided_slice %11 {offsets = [0, 0], sizes = [16, 32], strides = [1, 1]} : vector<16x96xf32> to vector<16x32xf32>
    %13 = vector.extract_strided_slice %11 {offsets = [0, 32], sizes = [16, 32], strides = [1, 1]} : vector<16x96xf32> to vector<16x32xf32>
    %14 = vector.extract_strided_slice %11 {offsets = [0, 64], sizes = [16, 32], strides = [1, 1]} : vector<16x96xf32> to vector<16x32xf32>
    %15 = vector.extract_strided_slice %12 {offsets = [0, 0], sizes = [8, 32], strides = [1, 1]} : vector<16x32xf32> to vector<8x32xf32>
    %16 = vector.shape_cast %15 : vector<8x32xf32> to vector<8x4x8xf32>
    %17 = tpu.transpose %16, [1, 0, 2] : vector<8x4x8xf32> -> vector<4x8x8xf32>
    %18 = arith.truncf %17 : vector<4x8x8xf32> to vector<4x8x8xbf16>
    %19 = vector.extract_strided_slice %13 {offsets = [0, 0], sizes = [8, 32], strides = [1, 1]} : vector<16x32xf32> to vector<8x32xf32>
    %20 = vector.shape_cast %19 : vector<8x32xf32> to vector<8x4x8xf32>
    %21 = tpu.transpose %20, [1, 0, 2] : vector<8x4x8xf32> -> vector<4x8x8xf32>
    %22 = arith.truncf %21 : vector<4x8x8xf32> to vector<4x8x8xbf16>
    %23 = vector.extract_strided_slice %14 {offsets = [0, 0], sizes = [8, 32], strides = [1, 1]} : vector<16x32xf32> to vector<8x32xf32>
    %24 = vector.shape_cast %23 : vector<8x32xf32> to vector<8x4x8xf32>
    %25 = tpu.transpose %24, [1, 0, 2] : vector<8x4x8xf32> -> vector<4x8x8xf32>
    %26 = arith.truncf %25 : vector<4x8x8xf32> to vector<4x8x8xbf16>
    "tpu.trace_start"() <{level = 10 : i32, message = "hqd,hkd->hqk"}> : () -> ()
    %cst_8 = arith.constant dense<0.000000e+00> : vector<4x8x8xf32>
    %27 = tpu.matmul %18, %22, %cst_8 {dimension_numbers = #tpu.dot_dimension_numbers<[2], [2], [1], [1], [0, 0, 0, 1, 1, 1], [0], [0]>} : vector<4x8x8xbf16>, vector<4x8x8xbf16>, vector<4x8x8xf32> -> vector<4x8x8xf32>
    "tpu.trace_stop"() : () -> ()
    %c0_9 = arith.constant 0 : index
    %c0_10 = arith.constant 0 : index
    %c0_11 = arith.constant 0 : index
    %28 = vector.load %arg3[%c0_9, %c0_10, %c0_11] : memref<2x1x8xf32, #tpu.memory_space<vmem>>, vector<1x1x8xf32>
    %29 = vector.shape_cast %28 : vector<1x1x8xf32> to vector<1x8xf32>
    %30 = vector.shape_cast %29 : vector<1x8xf32> to vector<1x1x8xf32>
    %31 = vector.broadcast %30 : vector<1x1x8xf32> to vector<4x8x8xf32>
    %32 = arith.addf %27, %31 : vector<4x8x8xf32>
    %cst_12 = arith.constant dense<0xFF800000> : vector<4x8xf32>
    %33 = vector.multi_reduction <maximumf>, %32, %cst_12 [2] : vector<4x8x8xf32> to vector<4x8xf32>
    %34 = vector.shape_cast %33 : vector<4x8xf32> to vector<4x8x1xf32>
    %35 = vector.broadcast %34 : vector<4x8x1xf32> to vector<4x8x8xf32>
    %36 = arith.subf %32, %35 : vector<4x8x8xf32>
    %37 = math.exp %36 : vector<4x8x8xf32>
    %cst_13 = arith.constant dense<0.000000e+00> : vector<4x8xf32>
    %38 = vector.multi_reduction <add>, %37, %cst_13 [2] : vector<4x8x8xf32> to vector<4x8xf32>
    %39 = vector.shape_cast %38 : vector<4x8xf32> to vector<4x8x1xf32>
    %40 = tpu.reciprocal %39 {approx = true} : vector<4x8x1xf32> -> vector<4x8x1xf32>
    %41 = vector.broadcast %40 : vector<4x8x1xf32> to vector<4x8x8xf32>
    %42 = arith.mulf %37, %41 : vector<4x8x8xf32>
    %43 = arith.truncf %42 : vector<4x8x8xf32> to vector<4x8x8xbf16>
    "tpu.trace_start"() <{level = 10 : i32, message = "hqk,hkd->hqd"}> : () -> ()
    %cst_14 = arith.constant dense<0.000000e+00> : vector<4x8x8xf32>
    %44 = tpu.matmul %43, %26, %cst_14 {dimension_numbers = #tpu.dot_dimension_numbers<[2], [1], [1], [2], [0, 0, 0, 1, 1, 2], [0], [0]>} : vector<4x8x8xbf16>, vector<4x8x8xbf16>, vector<4x8x8xf32> -> vector<4x8x8xf32>
    "tpu.trace_stop"() : () -> ()
    %45 = tpu.transpose %44, [1, 0, 2] : vector<4x8x8xf32> -> vector<8x4x8xf32>
    %46 = vector.shape_cast %45 : vector<8x4x8xf32> to vector<8x32xf32>
    %47 = vector.extract_strided_slice %12 {offsets = [8, 0], sizes = [8, 32], strides = [1, 1]} : vector<16x32xf32> to vector<8x32xf32>
    %48 = vector.shape_cast %47 : vector<8x32xf32> to vector<8x4x8xf32>
    %49 = tpu.transpose %48, [1, 0, 2] : vector<8x4x8xf32> -> vector<4x8x8xf32>
    %50 = arith.truncf %49 : vector<4x8x8xf32> to vector<4x8x8xbf16>
    %51 = vector.extract_strided_slice %13 {offsets = [8, 0], sizes = [8, 32], strides = [1, 1]} : vector<16x32xf32> to vector<8x32xf32>
    %52 = vector.shape_cast %51 : vector<8x32xf32> to vector<8x4x8xf32>
    %53 = tpu.transpose %52, [1, 0, 2] : vector<8x4x8xf32> -> vector<4x8x8xf32>
    %54 = arith.truncf %53 : vector<4x8x8xf32> to vector<4x8x8xbf16>
    %55 = vector.extract_strided_slice %14 {offsets = [8, 0], sizes = [8, 32], strides = [1, 1]} : vector<16x32xf32> to vector<8x32xf32>
    %56 = vector.shape_cast %55 : vector<8x32xf32> to vector<8x4x8xf32>
    %57 = tpu.transpose %56, [1, 0, 2] : vector<8x4x8xf32> -> vector<4x8x8xf32>
    %58 = arith.truncf %57 : vector<4x8x8xf32> to vector<4x8x8xbf16>
    "tpu.trace_start"() <{level = 10 : i32, message = "hqd,hkd->hqk"}> : () -> ()
    %cst_15 = arith.constant dense<0.000000e+00> : vector<4x8x8xf32>
    %59 = tpu.matmul %50, %54, %cst_15 {dimension_numbers = #tpu.dot_dimension_numbers<[2], [2], [1], [1], [0, 0, 0, 1, 1, 1], [0], [0]>} : vector<4x8x8xbf16>, vector<4x8x8xbf16>, vector<4x8x8xf32> -> vector<4x8x8xf32>
    "tpu.trace_stop"() : () -> ()
    %c1 = arith.constant 1 : index
    %c0_16 = arith.constant 0 : index
    %c0_17 = arith.constant 0 : index
    %60 = vector.load %arg3[%c1, %c0_16, %c0_17] : memref<2x1x8xf32, #tpu.memory_space<vmem>>, vector<1x1x8xf32>
    %61 = vector.shape_cast %60 : vector<1x1x8xf32> to vector<1x8xf32>
    %62 = vector.shape_cast %61 : vector<1x8xf32> to vector<1x1x8xf32>
    %63 = vector.broadcast %62 : vector<1x1x8xf32> to vector<4x8x8xf32>
    %64 = arith.addf %59, %63 : vector<4x8x8xf32>
    %cst_18 = arith.constant dense<0xFF800000> : vector<4x8xf32>
    %65 = vector.multi_reduction <maximumf>, %64, %cst_18 [2] : vector<4x8x8xf32> to vector<4x8xf32>
    %66 = vector.shape_cast %65 : vector<4x8xf32> to vector<4x8x1xf32>
    %67 = vector.broadcast %66 : vector<4x8x1xf32> to vector<4x8x8xf32>
    %68 = arith.subf %64, %67 : vector<4x8x8xf32>
    %69 = math.exp %68 : vector<4x8x8xf32>
    %cst_19 = arith.constant dense<0.000000e+00> : vector<4x8xf32>
    %70 = vector.multi_reduction <add>, %69, %cst_19 [2] : vector<4x8x8xf32> to vector<4x8xf32>
    %71 = vector.shape_cast %70 : vector<4x8xf32> to vector<4x8x1xf32>
    %72 = tpu.reciprocal %71 {approx = true} : vector<4x8x1xf32> -> vector<4x8x1xf32>
    %73 = vector.broadcast %72 : vector<4x8x1xf32> to vector<4x8x8xf32>
    %74 = arith.mulf %69, %73 : vector<4x8x8xf32>
    %75 = arith.truncf %74 : vector<4x8x8xf32> to vector<4x8x8xbf16>
    "tpu.trace_start"() <{level = 10 : i32, message = "hqk,hkd->hqd"}> : () -> ()
    %cst_20 = arith.constant dense<0.000000e+00> : vector<4x8x8xf32>
    %76 = tpu.matmul %75, %58, %cst_20 {dimension_numbers = #tpu.dot_dimension_numbers<[2], [1], [1], [2], [0, 0, 0, 1, 1, 2], [0], [0]>} : vector<4x8x8xbf16>, vector<4x8x8xbf16>, vector<4x8x8xf32> -> vector<4x8x8xf32>
    "tpu.trace_stop"() : () -> ()
    %77 = tpu.transpose %76, [1, 0, 2] : vector<4x8x8xf32> -> vector<8x4x8xf32>
    %78 = vector.shape_cast %77 : vector<8x4x8xf32> to vector<8x32xf32>
    %79 = tpu.concatenate %46, %78 in 0 : vector<8x32xf32>, vector<8x32xf32> -> vector<16x32xf32>
    %80 = arith.truncf %79 : vector<16x32xf32> to vector<16x32xbf16>
    %c0_21 = arith.constant 0 : index
    %c0_22 = arith.constant 0 : index
    %c0_23 = arith.constant 0 : index
    %81 = vector.load %arg6[%c0_21, %c0_22, %c0_23] : memref<1x32x32xbf16, #tpu.memory_space<vmem>>, vector<1x32x32xbf16>
    %82 = vector.shape_cast %81 : vector<1x32x32xbf16> to vector<32x32xbf16>
    %cst_24 = arith.constant dense<0.000000e+00> : vector<16x32xf32>
    %83 = tpu.matmul %80, %82, %cst_24 {dimension_numbers = #tpu.dot_dimension_numbers<[1], [0], [0], [1], [0, 0, 1, 1], [], []>} : vector<16x32xbf16>, vector<32x32xbf16>, vector<16x32xf32> -> vector<16x32xf32>
    %c0_25 = arith.constant 0 : index
    %c0_26 = arith.constant 0 : index
    %c0_27 = arith.constant 0 : index
    %84 = vector.load %arg7[%c0_25, %c0_26, %c0_27] : memref<1x1x32xf32, #tpu.memory_space<vmem>>, vector<1x1x32xf32>
    %85 = vector.shape_cast %84 : vector<1x1x32xf32> to vector<1x32xf32>
    %86 = vector.broadcast %85 : vector<1x32xf32> to vector<16x32xf32>
    %87 = arith.addf %83, %86 : vector<16x32xf32>
    %88 = arith.addf %3, %87 : vector<16x32xf32>
    %c0_28 = arith.constant 0 : index
    %c0_29 = arith.constant 0 : index
    %c0_30 = arith.constant 0 : index
    %89 = vector.load %arg8[%c0_28, %c0_29, %c0_30] : memref<1x1x32xf32, #tpu.memory_space<vmem>>, vector<1x1x32xf32>
    %90 = vector.shape_cast %89 : vector<1x1x32xf32> to vector<1x32xf32>
    %c0_31 = arith.constant 0 : index
    %c0_32 = arith.constant 0 : index
    %c0_33 = arith.constant 0 : index
    %91 = vector.load %arg9[%c0_31, %c0_32, %c0_33] : memref<1x1x32xf32, #tpu.memory_space<vmem>>, vector<1x1x32xf32>
    %92 = vector.shape_cast %91 : vector<1x1x32xf32> to vector<1x32xf32>
    %cst_34 = arith.constant dense<0.000000e+00> : vector<16xf32>
    %93 = vector.multi_reduction <add>, %88, %cst_34 [1] : vector<16x32xf32> to vector<16xf32>
    %94 = vector.shape_cast %93 : vector<16xf32> to vector<16x1xf32>
    %cst_35 = arith.constant 3.200000e+01 : f32
    %95 = vector.broadcast %cst_35 : f32 to vector<16x1xf32>
    %96 = arith.divf %94, %95 : vector<16x1xf32>
    %97 = vector.broadcast %96 : vector<16x1xf32> to vector<16x32xf32>
    %98 = arith.subf %88, %97 : vector<16x32xf32>
    %99 = arith.mulf %98, %98 : vector<16x32xf32>
    %cst_36 = arith.constant dense<0.000000e+00> : vector<16xf32>
    %100 = vector.multi_reduction <add>, %99, %cst_36 [1] : vector<16x32xf32> to vector<16xf32>
    %101 = vector.shape_cast %100 : vector<16xf32> to vector<16x1xf32>
    %cst_37 = arith.constant 3.200000e+01 : f32
    %102 = vector.broadcast %cst_37 : f32 to vector<16x1xf32>
    %103 = arith.divf %101, %102 : vector<16x1xf32>
    %104 = vector.broadcast %96 : vector<16x1xf32> to vector<16x32xf32>
    %105 = arith.subf %88, %104 : vector<16x32xf32>
    %cst_38 = arith.constant 9.99999974E-6 : f32
    %106 = vector.broadcast %cst_38 : f32 to vector<16x1xf32>
    %107 = arith.addf %103, %106 : vector<16x1xf32>
    %108 = math.rsqrt %107 : vector<16x1xf32>
    %109 = vector.broadcast %108 : vector<16x1xf32> to vector<16x32xf32>
    %110 = arith.mulf %105, %109 : vector<16x32xf32>
    %111 = vector.broadcast %90 : vector<1x32xf32> to vector<16x32xf32>
    %112 = arith.mulf %110, %111 : vector<16x32xf32>
    %113 = vector.broadcast %92 : vector<1x32xf32> to vector<16x32xf32>
    %114 = arith.addf %112, %113 : vector<16x32xf32>
    %115 = arith.truncf %114 : vector<16x32xf32> to vector<16x32xbf16>
    %c0_39 = arith.constant 0 : index
    %c0_40 = arith.constant 0 : index
    %c0_41 = arith.constant 0 : index
    %116 = vector.load %arg10[%c0_39, %c0_40, %c0_41] : memref<1x32x64xbf16, #tpu.memory_space<vmem>>, vector<1x32x64xbf16>
    %117 = vector.shape_cast %116 : vector<1x32x64xbf16> to vector<32x64xbf16>
    %cst_42 = arith.constant dense<0.000000e+00> : vector<16x64xf32>
    %118 = tpu.matmul %115, %117, %cst_42 {dimension_numbers = #tpu.dot_dimension_numbers<[1], [0], [0], [1], [0, 0, 1, 1], [], []>} : vector<16x32xbf16>, vector<32x64xbf16>, vector<16x64xf32> -> vector<16x64xf32>
    %c0_43 = arith.constant 0 : index
    %c0_44 = arith.constant 0 : index
    %c0_45 = arith.constant 0 : index
    %119 = vector.load %arg11[%c0_43, %c0_44, %c0_45] : memref<1x1x64xf32, #tpu.memory_space<vmem>>, vector<1x1x64xf32>
    %120 = vector.shape_cast %119 : vector<1x1x64xf32> to vector<1x64xf32>
    %121 = vector.broadcast %120 : vector<1x64xf32> to vector<16x64xf32>
    %122 = arith.addf %118, %121 : vector<16x64xf32>
    %cst_46 = arith.constant 0.000000e+00 : f32
    %123 = vector.broadcast %cst_46 : f32 to vector<16x64xf32>
    %124 = arith.maximumf %122, %123 : vector<16x64xf32>
    %125 = arith.truncf %124 : vector<16x64xf32> to vector<16x64xbf16>
    %c0_47 = arith.constant 0 : index
    %c0_48 = arith.constant 0 : index
    %c0_49 = arith.constant 0 : index
    %126 = vector.load %arg12[%c0_47, %c0_48, %c0_49] : memref<1x64x32xbf16, #tpu.memory_space<vmem>>, vector<1x64x32xbf16>
    %127 = vector.shape_cast %126 : vector<1x64x32xbf16> to vector<64x32xbf16>
    %cst_50 = arith.constant dense<0.000000e+00> : vector<16x32xf32>
    %128 = tpu.matmul %125, %127, %cst_50 {dimension_numbers = #tpu.dot_dimension_numbers<[1], [0], [0], [1], [0, 0, 1, 1], [], []>} : vector<16x64xbf16>, vector<64x32xbf16>, vector<16x32xf32> -> vector<16x32xf32>
    %c0_51 = arith.constant 0 : index
    %c0_52 = arith.constant 0 : index
    %c0_53 = arith.constant 0 : index
    %129 = vector.load %arg13[%c0_51, %c0_52, %c0_53] : memref<1x1x32xf32, #tpu.memory_space<vmem>>, vector<1x1x32xf32>
    %130 = vector.shape_cast %129 : vector<1x1x32xf32> to vector<1x32xf32>
    %131 = vector.broadcast %130 : vector<1x32xf32> to vector<16x32xf32>
    %132 = arith.addf %128, %131 : vector<16x32xf32>
    %133 = arith.addf %114, %132 : vector<16x32xf32>
    %c0_54 = arith.constant 0 : index
    %c0_55 = arith.constant 0 : index
    %c0_56 = arith.constant 0 : index
    %134 = vector.load %arg14[%c0_54, %c0_55, %c0_56] : memref<1x1x32xf32, #tpu.memory_space<vmem>>, vector<1x1x32xf32>
    %135 = vector.shape_cast %134 : vector<1x1x32xf32> to vector<1x32xf32>
    %c0_57 = arith.constant 0 : index
    %c0_58 = arith.constant 0 : index
    %c0_59 = arith.constant 0 : index
    %136 = vector.load %arg15[%c0_57, %c0_58, %c0_59] : memref<1x1x32xf32, #tpu.memory_space<vmem>>, vector<1x1x32xf32>
    %137 = vector.shape_cast %136 : vector<1x1x32xf32> to vector<1x32xf32>
    %cst_60 = arith.constant dense<0.000000e+00> : vector<16xf32>
    %138 = vector.multi_reduction <add>, %133, %cst_60 [1] : vector<16x32xf32> to vector<16xf32>
    %139 = vector.shape_cast %138 : vector<16xf32> to vector<16x1xf32>
    %cst_61 = arith.constant 3.200000e+01 : f32
    %140 = vector.broadcast %cst_61 : f32 to vector<16x1xf32>
    %141 = arith.divf %139, %140 : vector<16x1xf32>
    %142 = vector.broadcast %141 : vector<16x1xf32> to vector<16x32xf32>
    %143 = arith.subf %133, %142 : vector<16x32xf32>
    %144 = arith.mulf %143, %143 : vector<16x32xf32>
    %cst_62 = arith.constant dense<0.000000e+00> : vector<16xf32>
    %145 = vector.multi_reduction <add>, %144, %cst_62 [1] : vector<16x32xf32> to vector<16xf32>
    %146 = vector.shape_cast %145 : vector<16xf32> to vector<16x1xf32>
    %cst_63 = arith.constant 3.200000e+01 : f32
    %147 = vector.broadcast %cst_63 : f32 to vector<16x1xf32>
    %148 = arith.divf %146, %147 : vector<16x1xf32>
    %149 = vector.broadcast %141 : vector<16x1xf32> to vector<16x32xf32>
    %150 = arith.subf %133, %149 : vector<16x32xf32>
    %cst_64 = arith.constant 9.99999974E-6 : f32
    %151 = vector.broadcast %cst_64 : f32 to vector<16x1xf32>
    %152 = arith.addf %148, %151 : vector<16x1xf32>
    %153 = math.rsqrt %152 : vector<16x1xf32>
    %154 = vector.broadcast %153 : vector<16x1xf32> to vector<16x32xf32>
    %155 = arith.mulf %150, %154 : vector<16x32xf32>
    %156 = vector.broadcast %135 : vector<1x32xf32> to vector<16x32xf32>
    %157 = arith.mulf %155, %156 : vector<16x32xf32>
    %158 = vector.broadcast %137 : vector<1x32xf32> to vector<16x32xf32>
    %159 = arith.addf %157, %158 : vector<16x32xf32>
    %c0_65 = arith.constant 0 : index
    %c0_66 = arith.constant 0 : index
    %160 = vector.load %arg17[%c0_65, %c0_66] : memref<16x32xf32, #tpu.memory_space<vmem>>, vector<16x32xf32>
    tpu.vector_store %arg17[%c0_65, %c0_66], %159 {strides = array<i32>} : memref<16x32xf32, #tpu.memory_space<vmem>>, vector<16x32xf32>,
    %c1_i32 = arith.constant 1 : i32
    %161 = arith.cmpi eq, %arg1, %c1_i32 : i32
    %162 = arith.extui %161 : i1 to i32
    %c0_i32_67 = arith.constant 0 : i32
    %163 = arith.cmpi ne, %162, %c0_i32_67 : i32
    scf.if %163 {
      %164 = vector.shape_cast %159 : vector<16x32xf32> to vector<2x8x32xf32>
      %c0_68 = arith.constant 0 : index
      %c0_69 = arith.constant 0 : index
      %c0_70 = arith.constant 0 : index
      %165 = vector.load %arg16[%c0_68, %c0_69, %c0_70] : memref<2x8x32xf32, #tpu.memory_space<vmem>>, vector<2x8x32xf32>
      tpu.vector_store %arg16[%c0_68, %c0_69, %c0_70], %164 {strides = array<i32>} : memref<2x8x32xf32, #tpu.memory_space<vmem>>, vector<2x8x32xf32>,
    } else {
    }
    return
  }
  func.func @transform_0(%arg0: i32, %arg1: i32) -> (i32, i32, i32) {
    %c0_i32 = arith.constant 0 : i32
    %c0_i32_0 = arith.constant 0 : i32
    %c0_i32_1 = arith.constant 0 : i32
    return %arg0, %c0_i32, %c0_i32_0 : i32, i32, i32
  }
  func.func @transform_1(%arg0: i32, %arg1: i32) -> (i32, i32, i32) {
    %c0_i32 = arith.constant 0 : i32
    %c0_i32_0 = arith.constant 0 : i32
    %c0_i32_1 = arith.constant 0 : i32
    return %arg0, %c0_i32, %c0_i32_0 : i32, i32, i32
  }
  func.func @transform_2(%arg0: i32, %arg1: i32) -> (i32, i32, i32) {
    %c0_i32 = arith.constant 0 : i32
    %c0_i32_0 = arith.constant 0 : i32
    %c0_i32_1 = arith.constant 0 : i32
    return %arg1, %c0_i32, %c0_i32_0 : i32, i32, i32
  }
  func.func @transform_3(%arg0: i32, %arg1: i32) -> (i32, i32, i32) {
    %c0_i32 = arith.constant 0 : i32
    %c0_i32_0 = arith.constant 0 : i32
    %c0_i32_1 = arith.constant 0 : i32
    return %arg1, %c0_i32, %c0_i32_0 : i32, i32, i32
  }
  func.func @transform_4(%arg0: i32, %arg1: i32) -> (i32, i32, i32) {
    %c0_i32 = arith.constant 0 : i32
    %c0_i32_0 = arith.constant 0 : i32
    %c0_i32_1 = arith.constant 0 : i32
    return %arg1, %c0_i32, %c0_i32_0 : i32, i32, i32
  }
  func.func @transform_5(%arg0: i32, %arg1: i32) -> (i32, i32, i32) {
    %c0_i32 = arith.constant 0 : i32
    %c0_i32_0 = arith.constant 0 : i32
    %c0_i32_1 = arith.constant 0 : i32
    return %arg1, %c0_i32, %c0_i32_0 : i32, i32, i32
  }
  func.func @transform_6(%arg0: i32, %arg1: i32) -> (i32, i32, i32) {
    %c0_i32 = arith.constant 0 : i32
    %c0_i32_0 = arith.constant 0 : i32
    %c0_i32_1 = arith.constant 0 : i32
    return %arg1, %c0_i32, %c0_i32_0 : i32, i32, i32
  }
  func.func @transform_7(%arg0: i32, %arg1: i32) -> (i32, i32, i32) {
    %c0_i32 = arith.constant 0 : i32
    %c0_i32_0 = arith.constant 0 : i32
    %c0_i32_1 = arith.constant 0 : i32
    return %arg1, %c0_i32, %c0_i32_0 : i32, i32, i32
  }
  func.func @transform_8(%arg0: i32, %arg1: i32) -> (i32, i32, i32) {
    %c0_i32 = arith.constant 0 : i32
    %c0_i32_0 = arith.constant 0 : i32
    %c0_i32_1 = arith.constant 0 : i32
    return %arg1, %c0_i32, %c0_i32_0 : i32, i32, i32
  }
  func.func @transform_9(%arg0: i32, %arg1: i32) -> (i32, i32, i32) {
    %c0_i32 = arith.constant 0 : i32
    %c0_i32_0 = arith.constant 0 : i32
    %c0_i32_1 = arith.constant 0 : i32
    return %arg1, %c0_i32, %c0_i32_0 : i32, i32, i32
  }
  func.func @transform_10(%arg0: i32, %arg1: i32) -> (i32, i32, i32) {
    %c0_i32 = arith.constant 0 : i32
    %c0_i32_0 = arith.constant 0 : i32
    %c0_i32_1 = arith.constant 0 : i32
    return %arg1, %c0_i32, %c0_i32_0 : i32, i32, i32
  }
  func.func @transform_11(%arg0: i32, %arg1: i32) -> (i32, i32, i32) {
    %c0_i32 = arith.constant 0 : i32
    %c0_i32_0 = arith.constant 0 : i32
    %c0_i32_1 = arith.constant 0 : i32
    return %arg1, %c0_i32, %c0_i32_0 : i32, i32, i32
  }
  func.func @transform_12(%arg0: i32, %arg1: i32) -> (i32, i32, i32) {
    %c0_i32 = arith.constant 0 : i32
    %c0_i32_0 = arith.constant 0 : i32
    %c0_i32_1 = arith.constant 0 : i32
    return %arg1, %c0_i32, %c0_i32_0 : i32, i32, i32
  }
  func.func @transform_13(%arg0: i32, %arg1: i32) -> (i32, i32, i32) {
    %c0_i32 = arith.constant 0 : i32
    %c0_i32_0 = arith.constant 0 : i32
    %c0_i32_1 = arith.constant 0 : i32
    return %arg1, %c0_i32, %c0_i32_0 : i32, i32, i32
  }
  func.func @transform_14(%arg0: i32, %arg1: i32) -> (i32, i32, i32) {
    %c0_i32 = arith.constant 0 : i32
    %c0_i32_0 = arith.constant 0 : i32
    %c0_i32_1 = arith.constant 0 : i32
    return %arg0, %c0_i32, %c0_i32_0 : i32, i32, i32
  }
}

</mosaic_0001>

<bundles_post_ra>
// kernel: tpu_custom_call.1
= control target key start
LH: loop header
LB: loop body
LE: loop exit
PB: predicated region body
PF: predicated region fallthrough
CT: control target
= control target key end

     0   :  { %s4557_s0 = inlined_call_operand.hbm [shape: f32[2,8,32], index: 0, kind: input, shape index: {}]   ;;  %s4558_s1 = inlined_call_operand.hbm [shape: f32[2,1,8], index: 1, kind: input, shape index: {}]   ;;  %s4559_s2 = inlined_call_operand.vmem [shape: bf16[2,32,96], index: 2, kind: input, shape index: {}]   ;;  %s4560_s3 = inlined_call_operand.vmem [shape: f32[2,1,96], index: 3, kind: input, shape index: {}]   ;;  %s4561_s4 = inlined_call_operand.vmem [shape: bf16[2,32,32], index: 4, kind: input, shape index: {}]   ;;  %s4562_s5 = inlined_call_operand.vmem [shape: f32[2,1,32], index: 5, kind: input, shape index: {}]   ;;  %s4563_s6 = inlined_call_operand.vmem [shape: f32[2,1,32], index: 6, kind: input, shape index: {}]   ;;  %s4564_s7 = inlined_call_operand.vmem [shape: f32[2,1,32], index: 7, kind: input, shape index: {}]   ;;  %s4565_s8 = inlined_call_operand.vmem [shape: bf16[2,32,64], index: 8, kind: input, shape index: {}]   ;;  %s4566_s9 = inlined_call_operand.vmem [shape: f32[2,1,64], index: 9, kind: input, shape index: {}]   ;;  %s4567_s10 = inlined_call_operand.vmem [shape: bf16[2,64,32], index: 10, kind: input, shape index: {}]   ;;  %s4568_s11 = inlined_call_operand.vmem [shape: f32[2,1,32], index: 11, kind: input, shape index: {}]   ;;  %s4569_s12 = inlined_call_operand.vmem [shape: f32[2,1,32], index: 12, kind: input, shape index: {}]   ;;  %s4570_s13 = inlined_call_operand.vmem [shape: f32[2,1,32], index: 13, kind: input, shape index: {}]   ;;  %s4571_s14 = inlined_call_operand.hbm [shape: f32[2,8,32], index: 14, kind: output, shape index: {}]  }
   0x1   :  { %4575 = sst [smem:[#allocation15_spill]] %s4557_s0 }
   0x2   :  { %4576 = sst [smem:[#allocation16_spill]] %s4558_s1 }
   0x3   :  { %4577 = sst [smem:[#allocation17_spill]] %s4559_s2 }
   0x4   :  { %4578 = sst [smem:[#allocation18_spill]] %s4561_s4 }
   0x5   :  { %4579 = sst [smem:[#allocation19_spill]] %s4571_s14 }
   0x6   :  { %19 = vsyncpa [#allocation4], 0 }
   0x7   :  { %20 = vsyncpa [#allocation7], 0 }
   0x8   :  { %21 = vsyncpa [#allocation5], 0  ;;  %s3957_s29 = smov 0   ;;  %s3959_s30 = smov 0  }
   0x9   :  { %s3961_s15 = smov 0  }
   0xa LB: > { %4580 = sst [smem:[#allocation12_spill]] %s3856_s30  ;;  %s4572_s16 = sadd.s32 4294967295, %s3860_s15   ;;  %s3860_s15 = sphi %s3961_s15, %s27_s15   ;;  %s3856_s30 = sphi %s3959_s30, %s4600_s30   ;;  %s3852_s29 = sphi %s3957_s29, %s4599_s29  }
   0xb   : > { %4581 = sst [smem:[#allocation13_spill]] %s3860_s15  ;;  %s36_s17 = sadd.s32 1, %s3856_s30 }
   0xc   : > { %p37_p0 = scmp.ge.s32.totalorder %s36_s17, 2  ;;  %p3355_p1 = scmp.ge.s32.totalorder %s3860_s15, 1 }
   0xd   : > { %p434_p2 = scmp.lt.s32.totalorder %s3860_s15, 3  ;;  %p3984_p4 = scmp.eq.s32.totalorder %s4572_s16, 0 }
   0xe   : > { %s4602_s17 = smov (%p37_p0, %s36_s17), 0  ;;  %s3862_s20 = smov [#allocation3]  }
   0xf   : > { %4582 = sst [smem:[#allocation14_spill]] %s4602_s17  ;;  %p3978_p3 = pnand %p3355_p1, %p434_p2 }
  0x10   : > { %s449_s21 = sshll.u32 %s3862_s20, 4  ;;  %s3863_s23 = smov [#allocation6]   ;;  %s450_s21 = int_to_ptr.vmem [resolvable:$true] %s449_s21 }
  0x11   : > { %p3626_p5 = pneg %p3978_p3  ;;  %s465_s24 = sshll.u32 %s3863_s23, 4  ;;  %s466_s24 = int_to_ptr.vmem [resolvable:$true] %s465_s24 }
  0x12   : > { %s3761_s25 = scalar_lea.vmem %s450_s21, 256  ;;  %p3769_p11 = scmp.lt.s32.totalorder %s450_s21, %s450_s21 }
  0x13   : > { %p3992_p6 = pnand %p3984_p4, %p3626_p5  ;;  %p3762_p8 = scmp.ne.s32.totalorder %s450_s21, %s3761_s25 }
  0x14   : > { %p3770_p12 = scmp.lt.s32.totalorder %s3761_s25, %s3761_s25 }
  0x15   : > { %p3752_p7 = pneg %p3992_p6 }
  0x16   : > { %p3771_p13 = por %p3770_p12, %p3769_p11 }
  0x17   : > { %p3764_p9 = pnand %p3762_p8, %p3752_p7 }
  0x19   : > { %p3765_p10 = pneg %p3764_p9 }
  0x1b   : > { %p3772_p0 = pnand %p3771_p13, %p3765_p10 }
  0x1d   : > { %3775 = shalt.err (!%p3772_p0)
}
  0x1e   : > { %s3864_s26 = smov 128   ;;  %s3865_s27 = smov 8  }
  0x1f   : > { %s4586_s0 = sld [smem:[#allocation15_spill]]  ;;  %s3787_s23 = scalar_lea.vmem %s466_s24, 32 }
  0x20   : > { %p3788_p1 = scmp.ne.s32.totalorder %s466_s24, %s3787_s23  ;;  %p3795_p8 = scmp.lt.s32.totalorder %s466_s24, %s466_s24 }
  0x21   : > { %p3796_p9 = scmp.lt.s32.totalorder %s3787_s23, %s3787_s23 }
  0x22   : > { %p3790_p2 = pnand %p3788_p1, %p3752_p7 }
  0x23   : > { %p3797_p11 = por %p3796_p9, %p3795_p8 }
  0x24   : > { %p3791_p5 = pneg %p3790_p2 }
  0x25   : > { %3629 = dma.hbm_to_vmem [thread:$0]  (!%p3992_p6), %s4586_s0, 256, %s450_s21, [#allocation4], %s3864_s26, %s3864_s26, %s3865_s27  }
  0x26   : > { %p3798_p10 = pnand %p3797_p11, %p3791_p5 }
  0x28   : > { %3801 = shalt.err (!%p3798_p10)
}
  0x29   : > { %s3866_s25 = smov 16   ;;  %s3867_s16 = smov 1  }
  0x2a   : > { %s4587_s1 = sld [smem:[#allocation16_spill]] }
  0x2c   : > { %561 = sbr.rel (%p3978_p3) target bundleno = 3268 (0xcc4), region = 76 }
  0x30   : > { %3632 = dma.hbm_to_vmem [thread:$0]  (!%p3992_p6), %s4587_s1, 32, %s466_s24, [#allocation7], %s3866_s25, %s3866_s25, %s3867_s16  }
  0x31   : > { %3839 = dma.done.wait (%p3984_p4), [#allocation4], 256  }
  0x32   : > { %3841 = vsyncadd (%p3984_p4), [#allocation4], 4294967040 }
  0x33   : > { %3843 = dma.done.wait (%p3984_p4), [#allocation7], 32  }
  0x34   : > { %3845 = vsyncadd (%p3984_p4), [#allocation7], 4294967264  ;;  %p647_p7 = scmp.lt.s32.totalorder %s3852_s29, 1  ;;  %s4588_s2 = sld [smem:[#allocation17_spill]] }
  0x35   : > { %s4589_s4 = sld [smem:[#allocation18_spill]]  ;;  %p3370_p3 = scmp.ne.s32.totalorder %s3852_s29, 0 }
  0x36   : > { %s4026_s30 = scalar_select %p647_p7, %s3852_s29, 1 }
  0x38   : > { %s3432_s16 = sshll.u32 %s4026_s30, 4  ;;  %s684_s15 = scalar_lea.vmem %s4568_s11, %s4026_s30 }
  0x39   : > { %s4056_s22 = scalar_lea.vmem %s4565_s8, %s3432_s16  ;;  %s687_s19 = scalar_lea.vmem %s4569_s12, %s4026_s30 }
  0x3a   : > { %s651_s24 = scalar_lea.vmem %s4588_s2, %s3432_s16  ;;  %s676_s2 = scalar_lea.vmem %s4566_s9, %s4026_s30 }
  0x3b   : > { %s4039_s28 = scalar_lea.vmem %s4589_s4, %s3432_s16  ;;  %s3435_s4 = sshll.u32 %s4026_s30, 5 }
  0x3c   : > { %s4066_s25 = scalar_lea.vmem %s4567_s10, %s3435_s4  ;;  %s690_s14 = scalar_lea.vmem %s4570_s13, %s4026_s30 }
  0x3d   : > { %696 = sbr.rel (%p3370_p3) target bundleno = 68 (0x44), region = 88 }
  0x42   : > { %v697_v0 = vld [vmem:[#allocation3] sm:$0xff]  ;;  %vm699_vm0 = vcmask 261120   ;;  %v698_v1 = vld [vmem:[#allocation3 + $0x8] sm:$0xff] }
  0x43   : > { %700 = vst.msk [vmem:[#allocation2] sm:$0xff] %vm699_vm0, %v697_v0  ;;  %701 = vst.msk [vmem:[#allocation2 + $0x8] sm:$0xff] %vm699_vm0, %v698_v1 }
  0x44 PF: > { %v3698_v2 = vld [vmem:[%s651_s24 + $0x8] sm:$0xff]   ;;  %v3868_v3 = vmov 0.0   ;;  %v3699_v4 = vld [vmem:[%s651_s24] sm:$0xff]   ;;  %vm3869_vm1 = vmmov 0   ;;  %vm728_vm2 = vcmask 261120   ;;  %s4590_s18 = scalar_lea.vmem %s4560_s3, %s4026_s30  ;;  %s3870_s26 = smov 104   ;;  %v788_v20 = vlaneseq }
  0x45   : > { %3482 = vmatprep.subr.bf16.mxu0 %v3868_v3  ;;  %3490 = vmatprep.subr.bf16.mxu1 %v3868_v3  ;;  %v3371_v8 = vld [vmem:[%s4590_s18] ss:$0 sm:$0xff]  ;;  %s3871_s27 = smov 120   ;;  %s3872_s20 = smov 96   ;;  %v3874_v18 = vmov 1983009808  }
  0x46   : > { %3483 = vmatpush3.bf16.msra.mxu0 %v3698_v2  ;;  %3486 = vmatprep.mubr.msk.bf16.mxu0 %vm3869_vm1, %v3868_v3  ;;  %s3873_s23 = smov 112   ;;  %v786_v19 = vunpack.c.l.s4 %v3874_v18  ;;  %v789_v22 = vshrl.u32 %v788_v20, 7  ;;  %v3875_v23 = vmov 1934713408   ;;  %vm1234_vm3 = vcmask 64512   ;;  %s3876_s0 = smov 64  }
  0x47   : > { %3484 = vmatprep.subr.bf16.mxu0 %v3868_v3  ;;  %3492 = vmatprep.mubr.msk.bf16.mxu1 %vm3869_vm1, %v3868_v3  ;;  %v818_v24 = vunpack.c.l.s4 %v3875_v23  ;;  %vm1470_vm4 = vcmask 1043456   ;;  %s3878_s1 = smov 8   ;;  %s3879_s17 = smov 24   ;;  %vm1801_vm5 = vcmask 130048   ;;  %vm1803_vm6 = vcmask 195584  }
  0x48   : > { %v787_v21 = vunpack.c.0.s8 %v786_v19  ;;  %s4591_s4 = scalar_lea.vmem %s4562_s5, %s4026_s30  ;;  %s4592_s18 = scalar_lea.vmem %s4563_s6, %s4026_s30  ;;  %vm3059_vm7 = vcmask 523264  }
  0x49   : > { %v819_v30 = vunpack.c.0.s8 %v818_v24  ;;  %p3427_p4 = scmp.ne.s32.totalorder %s3852_s29, 1 }
  0x4a   : > { %v702_v5 = vld [vmem:[#allocation2] sm:$0xff]  ;;  %v703_v6 = vld [vmem:[#allocation2 + $0x8] sm:$0xff]  ;;  %3485 = vmatpush3.bf16.msra.mxu0 %v3699_v4  ;;  %v4125_v27 = vsub.s32 %v787_v21, %v789_v22 }
  0x4b   : > { %v704_v7 = vpack.c.bf16 %v703_v6, %v702_v5  ;;  %3496 = vmatprep.subr.bf16.mxu0 %v3868_v3  ;;  %v4135_v37 = vsub.s32 %v819_v30, %v789_v22 }
  0x4d   : > { %3487 = vmatmul.mubr.msk.bf16.vlgmr.msra.gmra.mxu0 %vm728_vm2, %v704_v7 }
  0x4e   : > { %3498 = vmatprep.mubr.msk.bf16.mxu0 %vm3869_vm1, %v3868_v3 }
 0x10d   : > { %v766_v9 = vpop.f32.mrf.mxu0 }
 0x10e   : > { %v4097_v10 = vadd.f32 %v3371_v8, %v766_v9 }
 0x10f   : > { %v3488_v11 = vpop.f32.mrf.mxu0 }
 0x110   : > { %780 = vrot.lane.b32.xlu1 %v4097_v10, %s3870_s26  ;;  %774 = vrot.lane.b32.xlu0 %v4097_v10, %s3871_s27 }
 0x111   : > { %v769_v12 = vpop.f32.mrf.mxu0 }
 0x112   : > { %v4103_v13 = vadd.f32 %v3371_v8, %v769_v12 }
 0x113   : > { %v3489_v14 = vpop.f32.mrf.mxu0 }
 0x114   : > { %923 = vrot.lane.b32.xlu1 %v4097_v10, %s3872_s20  ;;  %777 = vrot.lane.b32.xlu0 %v4097_v10, %s3873_s23 }
 0x182   : > { %v4109_v15 = vpop.permute.xlu0 %774  ;;  %v4113_v16 = vpop.permute.xlu1 %780 }
 0x183   : > { %925 = vrot.lane.b32.xlu0 %v4109_v15, %s3872_s20  ;;  %v799_v28 = vcombine.low %v4109_v15, %v4113_v16  ;;  %v800_v29 = vcombine.high %v4109_v15, %v4113_v16 }
 0x185   : > { %v807_v33 = vrot.slane %v799_v28, %v4125_v27  ;;  %v814_v34 = vrot.slane %v800_v29, %v4125_v27 }
 0x186   : > { %v4115_v17 = vpop.permute.xlu0 %777  ;;  %v924_v35 = vpop.permute.xlu1 %923 }
 0x187   : > { %929 = vrot.lane.b32.xlu0 %v4113_v16, %s3872_s20  ;;  %927 = vrot.lane.b32.xlu1 %v4115_v17, %s3872_s20  ;;  %v783_v25 = vcombine.low %v4097_v10, %v4115_v17  ;;  %v784_v26 = vcombine.high %v4097_v10, %v4115_v17 }
 0x189   : > { %v791_v31 = vrot.slane %v783_v25, %v4125_v27  ;;  %v798_v32 = vrot.slane %v784_v26, %v4125_v27 }
 0x18b   : > { %v815_v38 = vcombine.low %v791_v31, %v807_v33  ;;  %v816_v39 = vcombine.high %v791_v31, %v807_v33  ;;  %v831_v40 = vcombine.low %v798_v32, %v814_v34  ;;  %v832_v41 = vcombine.high %v798_v32, %v814_v34 }
 0x18d   : > { %v823_v48 = vrot.slane %v815_v38, %v4135_v37  ;;  %v830_v49 = vrot.slane %v816_v39, %v4135_v37  ;;  %v839_v50 = vrot.slane %v831_v40, %v4135_v37  ;;  %v846_v51 = vrot.slane %v832_v41, %v4135_v37 }
 0x18f   : > { %v851_v60 = vcombine.low %v823_v48, %v830_v49  ;;  %v3375_v61 = vcombine.high %v823_v48, %v830_v49  ;;  %v867_v62 = vcombine.low %v839_v50, %v846_v51  ;;  %v3376_v63 = vcombine.high %v839_v50, %v846_v51 }
 0x191   : > { %v858_v9 = vrot.slane %v851_v60, %v4125_v27  ;;  %v866_v11 = vrot.slane %v3375_v61, %v4125_v27  ;;  %v874_v12 = vrot.slane %v867_v62, %v4125_v27  ;;  %v882_v14 = vrot.slane %v3376_v63, %v4125_v27  ;;  %v3381_v60 = vld [vmem:[#allocation6] ss:$0 sm:$0xff] }
 0x193   : > { %v883_v29 = vcombine.low %v858_v9, %v866_v11  ;;  %v899_v30 = vcombine.low %v874_v12, %v882_v14 }
 0x195   : > { %v891_v38 = vrot.slane %v883_v29, %v4135_v37  ;;  %v907_v39 = vrot.slane %v899_v30, %v4135_v37 }
 0x1f5   : > { %v926_v36 = vpop.permute.xlu0 %925 }
 0x1f9   : > { %v928_v42 = vpop.permute.xlu1 %927  ;;  %v930_v43 = vpop.permute.xlu0 %929 }
 0x1fa   : > { %v935_v44 = vcombine.low %v924_v35, %v928_v42  ;;  %v936_v45 = vcombine.high %v924_v35, %v928_v42  ;;  %v951_v46 = vcombine.low %v926_v36, %v930_v43  ;;  %v952_v47 = vcombine.high %v926_v36, %v930_v43 }
 0x1fc   : > { %v943_v52 = vrot.slane %v935_v44, %v4125_v27  ;;  %v950_v53 = vrot.slane %v936_v45, %v4125_v27  ;;  %v959_v54 = vrot.slane %v951_v46, %v4125_v27  ;;  %v966_v55 = vrot.slane %v952_v47, %v4125_v27 }
 0x1fd   : > { %v884_v44 = vcombine.high %v858_v9, %v866_v11  ;;  %v900_v45 = vcombine.high %v874_v12, %v882_v14  ;;  %v915_v46 = vcombine.low %v891_v38, %v907_v39  ;;  %v916_v47 = vcombine.high %v891_v38, %v907_v39 }
 0x1fe   : > { %v967_v56 = vcombine.low %v943_v52, %v959_v54  ;;  %v968_v57 = vcombine.high %v943_v52, %v959_v54  ;;  %v983_v58 = vcombine.low %v950_v53, %v966_v55  ;;  %v984_v59 = vcombine.high %v950_v53, %v966_v55 }
 0x1ff   : > { %v919_v50 = vpack.c.bf16 %v915_v46, %v915_v46  ;;  %v920_v51 = vpack.c.bf16 %v916_v47, %v916_v47  ;;  %v898_v52 = vrot.slane %v884_v44, %v4135_v37  ;;  %v914_v53 = vrot.slane %v900_v45, %v4135_v37 }
 0x200   : > { %v975_v0 = vrot.slane %v967_v56, %v4135_v37  ;;  %v982_v1 = vrot.slane %v968_v57, %v4135_v37  ;;  %v991_v2 = vrot.slane %v983_v58, %v4135_v37  ;;  %v998_v4 = vrot.slane %v984_v59, %v4135_v37 }
 0x201   : > { %v917_v56 = vcombine.low %v898_v52, %v914_v53  ;;  %v918_v57 = vcombine.high %v898_v52, %v914_v53 }
 0x202   : > { %v1003_v5 = vcombine.low %v975_v0, %v982_v1  ;;  %v3377_v6 = vcombine.high %v975_v0, %v982_v1  ;;  %v1019_v7 = vcombine.low %v991_v2, %v998_v4  ;;  %v3378_v8 = vcombine.high %v991_v2, %v998_v4 }
 0x203   : > { %v921_v58 = vpack.c.bf16 %v917_v56, %v917_v56  ;;  %v922_v59 = vpack.c.bf16 %v918_v57, %v918_v57 }
 0x204   : > { %v1010_v18 = vrot.slane %v1003_v5, %v4125_v27  ;;  %v1018_v19 = vrot.slane %v3377_v6, %v4125_v27  ;;  %v1026_v20 = vrot.slane %v1019_v7, %v4125_v27  ;;  %v1034_v21 = vrot.slane %v3378_v8, %v4125_v27 }
 0x206   : > { %v1035_v22 = vcombine.low %v1010_v18, %v1018_v19  ;;  %v1051_v23 = vcombine.low %v1026_v20, %v1034_v21  ;;  %v1036_v24 = vcombine.high %v1010_v18, %v1018_v19  ;;  %v1052_v25 = vcombine.high %v1026_v20, %v1034_v21 }
 0x208   : > { %v1043_v26 = vrot.slane %v1035_v22, %v4135_v37  ;;  %v1059_v28 = vrot.slane %v1051_v23, %v4135_v37  ;;  %v1050_v33 = vrot.slane %v1036_v24, %v4135_v37  ;;  %v1066_v34 = vrot.slane %v1052_v25, %v4135_v37 }
 0x20a   : > { %v1067_v31 = vcombine.low %v1043_v26, %v1059_v28  ;;  %v1068_v32 = vcombine.high %v1043_v26, %v1059_v28  ;;  %v1069_v42 = vcombine.low %v1050_v33, %v1066_v34  ;;  %v1070_v43 = vcombine.high %v1050_v33, %v1066_v34 }
 0x20c   : > { %v1071_v35 = vpack.c.bf16 %v1067_v31, %v1067_v31  ;;  %v1072_v36 = vpack.c.bf16 %v1068_v32, %v1068_v32  ;;  %v1073_v48 = vpack.c.bf16 %v1069_v42, %v1069_v42  ;;  %v1074_v49 = vpack.c.bf16 %v1070_v43, %v1070_v43 }
 0x20e   : > { %v1239_v40 = vsel %vm1234_vm3, %v1071_v35, 0  ;;  %v1285_v41 = vsel %vm1234_vm3, %v1072_v36, 0  ;;  %v1331_v54 = vsel %vm1234_vm3, %v1073_v48, 0  ;;  %v1377_v55 = vsel %vm1234_vm3, %v1074_v49, 0 }
 0x20f   : > { %3491 = vmatpush3.bf16.xpose.msra.mxu1 %v1239_v40  ;;  %3497 = vmatpush3.bf16.xpose.msra.mxu0 %v1285_v41 }
 0x210   : > { %3502 = vmatprep.subr.bf16.mxu1 %v3868_v3  ;;  %3508 = vmatprep.subr.bf16.mxu0 %v3868_v3 }
 0x216   : > { %3493 = vmatmul.mubr.msk.bf16.vlgmr.msra.gmra.mxu1 %vm1234_vm3, %v919_v50  ;;  %3499 = vmatmul.mubr.msk.bf16.vlgmr.msra.gmra.mxu0 %vm1234_vm3, %v920_v51 }
 0x217   : > { %3503 = vmatpush3.bf16.xpose.msra.mxu1 %v1331_v54  ;;  %3509 = vmatpush3.bf16.xpose.msra.mxu0 %v1377_v55 }
 0x218   : > { %3504 = vmatprep.mubr.msk.bf16.mxu1 %vm3869_vm1, %v3868_v3  ;;  %3510 = vmatprep.mubr.msk.bf16.mxu0 %vm3869_vm1, %v3868_v3 }
 0x219   : > { %3514 = vmatprep.subr.bf16.mxu1 %v3868_v3  ;;  %3520 = vmatprep.subr.bf16.mxu0 %v3868_v3 }
 0x21e   : > { %3505 = vmatmul.mubr.msk.bf16.vlgmr.msra.gmra.mxu1 %vm1234_vm3, %v921_v58  ;;  %3511 = vmatmul.mubr.msk.bf16.vlgmr.msra.gmra.mxu0 %vm1234_vm3, %v922_v59 }
 0x21f   : > { %3516 = vmatprep.mubr.msk.bf16.mxu1 %vm3869_vm1, %v3868_v3  ;;  %3522 = vmatprep.mubr.msk.bf16.mxu0 %vm3869_vm1, %v3868_v3 }
 0x2d6   : > { %v1275_v61 = vpop.f32.mrf.mxu1  ;;  %v1321_v62 = vpop.f32.mrf.mxu0 }
 0x2d7   : > { %v1276_v63 = vadd.f32 %v3381_v60, %v1275_v61  ;;  %v1322_v0 = vadd.f32 %v3381_v60, %v1321_v62 }
 0x2d8   : > { %v3494_v1 = vpop.f32.mrf.mxu1  ;;  %v3500_v2 = vpop.f32.mrf.mxu0 }
 0x2d9   : > { %v1419_v4 = vsel %vm1234_vm3, %v1276_v63, -inf  ;;  %v1422_v5 = vsel %vm1234_vm3, %v1322_v0, -inf }
 0x2da   : > { %1420 = vmax.xlane.f32.xlu1 %v1419_v4  ;;  %v1278_v6 = vpop.f32.mrf.mxu1  ;;  %1423 = vmax.xlane.f32.xlu0 %v1422_v5  ;;  %v1324_v7 = vpop.f32.mrf.mxu0 }
 0x2dc   : > { %v3495_v8 = vpop.f32.mrf.mxu1  ;;  %v3501_v9 = vpop.f32.mrf.mxu0 }
 0x2de   : > { %v1367_v11 = vpop.f32.mrf.mxu1  ;;  %v1413_v12 = vpop.f32.mrf.mxu0 }
 0x2df   : > { %v1368_v14 = vadd.f32 %v3381_v60, %v1367_v11  ;;  %v1414_v25 = vadd.f32 %v3381_v60, %v1413_v12 }
 0x2e0   : > { %v3506_v18 = vpop.f32.mrf.mxu1  ;;  %v3512_v19 = vpop.f32.mrf.mxu0 }
 0x2e1   : > { %v1425_v20 = vsel %vm1234_vm3, %v1368_v14, -inf  ;;  %v1428_v26 = vsel %vm1234_vm3, %v1414_v25, -inf }
 0x2e2   : > { %v1370_v21 = vpop.f32.mrf.mxu1  ;;  %1426 = vmax.xlane.f32.xlu0 %v1425_v20  ;;  %v1416_v22 = vpop.f32.mrf.mxu0 }
 0x2e4   : > { %v3507_v23 = vpop.f32.mrf.mxu1  ;;  %v3513_v24 = vpop.f32.mrf.mxu0 }
 0x2eb   : > { %1809 = vrot.lane.b32.xlu1 %v4103_v13, %s3873_s23 }
 0x2ef   : > { %1812 = vrot.lane.b32.xlu1 %v4103_v13, %s3870_s26 }
 0x2f8   : > { %1806 = vrot.lane.b32.xlu0 %v4103_v13, %s3871_s27 }
 0x2fc   : > { %1075 = vrot.lane.b32.xlu0 %v4097_v10, %s3876_s0 }
 0x300   : > { %1079 = vrot.lane.b32.xlu0 %v4115_v17, %s3876_s0 }
 0x304   : > { %1955 = vrot.lane.b32.xlu0 %v4103_v13, %s3872_s20 }
 0x313   : > { %1429 = vmax.xlane.f32.xlu1 %v1428_v26 }
 0x324   : > { %1077 = vrot.lane.b32.xlu1 %v4109_v15, %s3876_s0 }
 0x328   : > { %1081 = vrot.lane.b32.xlu1 %v4113_v16, %s3876_s0 }
 0x363   : > { %v1421_v28 = vpop.xlane.xlu1 %1420  ;;  %v1424_v10 = vpop.xlane.xlu0 %1423 }
 0x364   : > { %v1431_v29 = vsub.f32 %v1276_v63, %v1421_v28  ;;  %v1432_v16 = vsub.f32 %v1322_v0, %v1424_v10 }
 0x366   : > { %v1435_v30 = vmul.f32 1.442695, %v1431_v29  ;;  %v1437_v38 = vmul.f32 1.442695, %v1432_v16 }
 0x367   : > { %v4219_v40 = vpop.permute.xlu1 %1809 }
 0x368   : > { %3708 = vpow2.f32 %v1435_v30 }
 0x36b   : > { %v1427_v31 = vpop.xlane.xlu0 %1426  ;;  %v4225_v42 = vpop.permute.xlu1 %1812 }
 0x36c   : > { %v1433_v17 = vsub.f32 %v1368_v14, %v1427_v31 }
 0x36e   : > { %v1439_v32 = vmul.f32 1.442695, %v1433_v17 }
 0x36f   : > { %v4205_v33 = vpop.permute.xlu0 %1806 }
 0x370   : > { %3710 = vpow2.f32 %v1439_v32  ;;  %1957 = vrot.lane.b32.xlu1 %v4205_v33, %s3872_s20 }
 0x371   : > { %3712 = vpow2.f32 %v1437_v38 }
 0x373   : > { %v1076_v43 = vpop.permute.xlu0 %1075 }
 0x375   : > { %v4209_v34 = vpop.eup %3708 }
 0x376   : > { %v1443_v15 = vsel %vm1234_vm3, %v4209_v34, 0.0 }
 0x377   : > { %1444 = vadd.xlane.f32.xlu0 %v1443_v15  ;;  %v1080_v47 = vpop.permute.xlu0 %1079 }
 0x378   : > { %v1087_v49 = vcombine.low %v1076_v43, %v1080_v47  ;;  %v1088_v50 = vcombine.high %v1076_v43, %v1080_v47 }
 0x37a   : > { %v1095_v54 = vrot.slane %v1087_v49, %v4125_v27  ;;  %v1102_v55 = vrot.slane %v1088_v50, %v4125_v27 }
 0x37b   : > { %v1956_v15 = vpop.permute.xlu0 %1955 }
 0x37d   : > { %v4213_v35 = vpop.eup %3710 }
 0x37e   : > { %v1449_v36 = vsel %vm1234_vm3, %v4213_v35, 0.0  ;;  %v4217_v39 = vpop.eup %3712 }
 0x37f   : > { %1450 = vadd.xlane.f32.xlu0 %v1449_v36  ;;  %v1446_v41 = vsel %vm1234_vm3, %v4217_v39, 0.0 }
 0x394   : > { %1447 = vadd.xlane.f32.xlu1 %v1446_v41 }
 0x395   : > { %1959 = vrot.lane.b32.xlu0 %v4219_v40, %s3872_s20 }
 0x39c   : > { %v1430_v44 = vpop.xlane.xlu1 %1429 }
 0x39d   : > { %v1434_v45 = vsub.f32 %v1414_v25, %v1430_v44 }
 0x39f   : > { %v1441_v46 = vmul.f32 1.442695, %v1434_v45 }
 0x3a0   : > { %v1078_v48 = vpop.permute.xlu1 %1077 }
 0x3a1   : > { %3714 = vpow2.f32 %v1441_v46 }
 0x3a4   : > { %v1082_v51 = vpop.permute.xlu1 %1081 }
 0x3a5   : > { %v1103_v52 = vcombine.low %v1078_v48, %v1082_v51  ;;  %v1104_v53 = vcombine.high %v1078_v48, %v1082_v51 }
 0x3a7   : > { %v1111_v56 = vrot.slane %v1103_v52, %v4125_v27  ;;  %v1118_v57 = vrot.slane %v1104_v53, %v4125_v27 }
 0x3a9   : > { %v1119_v58 = vcombine.low %v1095_v54, %v1111_v56  ;;  %v1120_v59 = vcombine.high %v1095_v54, %v1111_v56  ;;  %v1135_v60 = vcombine.low %v1102_v55, %v1118_v57  ;;  %v1136_v61 = vcombine.high %v1102_v55, %v1118_v57 }
 0x3aa   : > { %v1832_v55 = vcombine.high %v4205_v33, %v4225_v42  ;;  %v1816_v56 = vcombine.high %v4103_v13, %v4219_v40 }
 0x3ab   : > { %v1127_v62 = vrot.slane %v1119_v58, %v4135_v37  ;;  %v1134_v63 = vrot.slane %v1120_v59, %v4135_v37  ;;  %v1143_v0 = vrot.slane %v1135_v60, %v4135_v37  ;;  %v1150_v1 = vrot.slane %v1136_v61, %v4135_v37 }
 0x3ac   : > { %v1846_v58 = vrot.slane %v1832_v55, %v4125_v27  ;;  %v1830_v60 = vrot.slane %v1816_v56, %v4125_v27 }
 0x3ad   : > { %v1155_v2 = vcombine.low %v1127_v62, %v1134_v63  ;;  %v3379_v4 = vcombine.high %v1127_v62, %v1134_v63  ;;  %v1171_v5 = vcombine.low %v1143_v0, %v1150_v1  ;;  %v3380_v6 = vcombine.high %v1143_v0, %v1150_v1 }
 0x3ae   : > { %v4235_v7 = vpop.eup %3714  ;;  %v1863_v1 = vcombine.low %v1830_v60, %v1846_v58 }
 0x3af   : > { %v1162_v8 = vrot.slane %v1155_v2, %v4125_v27  ;;  %v1170_v9 = vrot.slane %v3379_v4, %v4125_v27  ;;  %v1178_v11 = vrot.slane %v1171_v5, %v4125_v27  ;;  %v1186_v12 = vrot.slane %v3380_v6, %v4125_v27 }
 0x3b0   : > { %v1452_v14 = vsel %vm1234_vm3, %v4235_v7, 0.0  ;;  %v1864_v2 = vcombine.high %v1830_v60, %v1846_v58 }
 0x3b1   : > { %1453 = vadd.xlane.f32.xlu1 %v1452_v14  ;;  %v1187_v18 = vcombine.low %v1162_v8, %v1170_v9  ;;  %v1203_v19 = vcombine.low %v1178_v11, %v1186_v12  ;;  %v1188_v20 = vcombine.high %v1162_v8, %v1170_v9  ;;  %v1204_v21 = vcombine.high %v1178_v11, %v1186_v12 }
 0x3b2   : > { %v1871_v14 = vrot.slane %v1863_v1, %v4135_v37 }
 0x3b3   : > { %v1195_v22 = vrot.slane %v1187_v18, %v4135_v37  ;;  %v1211_v23 = vrot.slane %v1203_v19, %v4135_v37  ;;  %v1202_v24 = vrot.slane %v1188_v20, %v4135_v37  ;;  %v1218_v25 = vrot.slane %v1204_v21, %v4135_v37 }
 0x3b4   : > { %v1878_v18 = vrot.slane %v1864_v2, %v4135_v37 }
 0x3b5   : > { %v1219_v26 = vcombine.low %v1195_v22, %v1211_v23  ;;  %v1220_v28 = vcombine.high %v1195_v22, %v1211_v23  ;;  %v1221_v29 = vcombine.low %v1202_v24, %v1218_v25  ;;  %v1222_v30 = vcombine.high %v1202_v24, %v1218_v25 }
 0x3b7   : > { %v1223_v10 = vpack.c.bf16 %v1219_v26, %v1219_v26  ;;  %v1224_v31 = vpack.c.bf16 %v1220_v28, %v1220_v28  ;;  %v1225_v43 = vpack.c.bf16 %v1221_v29, %v1221_v29  ;;  %v1226_v52 = vpack.c.bf16 %v1222_v30, %v1222_v30 }
 0x3b8   : > { %v1899_v30 = vcombine.low %v1871_v14, %v1878_v18 }
 0x3b9   : > { %v1472_v17 = vsel %vm1470_vm4, %v1223_v10, 0  ;;  %v1518_v32 = vsel %vm1470_vm4, %v1224_v31, 0  ;;  %v1564_v45 = vsel %vm1470_vm4, %v1225_v43, 0  ;;  %v1610_v54 = vsel %vm1470_vm4, %v1226_v52, 0 }
 0x3ba   : > { %3515 = vmatpush3.bf16.msra.mxu1 %v1472_v17  ;;  %3521 = vmatpush3.bf16.msra.mxu0 %v1518_v32  ;;  %v3393_v10 = vcombine.high %v1871_v14, %v1878_v18 }
 0x3bb   : > { %3526 = vmatprep.subr.bf16.mxu1 %v3868_v3  ;;  %3532 = vmatprep.subr.bf16.mxu0 %v3868_v3 }
 0x3c2   : > { %1961 = vrot.lane.b32.xlu1 %v4225_v42, %s3872_s20  ;;  %s4593_s20 = scalar_lea.vmem %s4564_s7, %s4026_s30 }
 0x3e2   : > { %v1958_v48 = vpop.permute.xlu1 %1957 }
 0x400   : > { %v1445_v16 = vpop.xlane.xlu0 %1444 }
 0x401   : > { %3716 = vrcp.f32 %v1445_v16 }
 0x408   : > { %v1451_v36 = vpop.xlane.xlu0 %1450 }
 0x409   : > { %3718 = vrcp.f32 %v1451_v36 }
 0x40c   : > { %v1960_v61 = vpop.permute.xlu0 %1959 }
 0x40d   : > { %v1967_v4 = vcombine.low %v1956_v15, %v1960_v61  ;;  %v1968_v5 = vcombine.high %v1956_v15, %v1960_v61 }
 0x40e   : > { %v3717_v38 = vpop.eup %3716 }
 0x40f   : > { %v1459_v41 = vmul.f32 %v3717_v38, %v4209_v34  ;;  %v1975_v19 = vrot.slane %v1967_v4, %v4125_v27  ;;  %v1982_v20 = vrot.slane %v1968_v5, %v4125_v27 }
 0x411   : > { %v1463_v44 = vpack.c.bf16 %v1459_v41, %v1459_v41 }
 0x413   : > { %3517 = vmatmul.mubr.msk.bf16.vlgmr.msra.gmra.mxu1 %vm1234_vm3, %v1463_v44 }
 0x414   : > { %3527 = vmatpush3.bf16.msra.mxu1 %v1564_v45  ;;  %3528 = vmatprep.mubr.msk.bf16.mxu1 %vm3869_vm1, %v3868_v3 }
 0x415   : > { %3538 = vmatprep.subr.bf16.mxu1 %v3868_v3 }
 0x416   : > { %v3719_v46 = vpop.eup %3718 }
 0x417   : > { %v1461_v47 = vmul.f32 %v3719_v46, %v4213_v35  ;;  %v1831_v35 = vcombine.low %v4205_v33, %v4225_v42  ;;  %v1906_v46 = vrot.slane %v1899_v30, %v4125_v27 }
 0x419   : > { %v1465_v49 = vpack.c.bf16 %v1461_v47, %v1461_v47  ;;  %v1839_v57 = vrot.slane %v1831_v35, %v4125_v27  ;;  %v1914_v47 = vrot.slane %v3393_v10, %v4125_v27 }
 0x41b   : > { %3529 = vmatmul.mubr.msk.bf16.vlgmr.msra.gmra.mxu1 %vm1234_vm3, %v1465_v49  ;;  %v1931_v58 = vcombine.low %v1906_v46, %v1914_v47 }
 0x41c   : > { %3540 = vmatprep.mubr.msk.bf16.mxu1 %vm3869_vm1, %v3868_v3 }
 0x41d   : > { %v1448_v34 = vpop.xlane.xlu1 %1447  ;;  %v1939_v1 = vrot.slane %v1931_v58, %v4135_v37 }
 0x41e   : > { %3720 = vrcp.f32 %v1448_v34 }
 0x42b   : > { %v3721_v50 = vpop.eup %3720 }
 0x42c   : > { %v1460_v51 = vmul.f32 %v3721_v50, %v4217_v39  ;;  %v1815_v39 = vcombine.low %v4103_v13, %v4219_v40 }
 0x42e   : > { %v1464_v53 = vpack.c.bf16 %v1460_v51, %v1460_v51  ;;  %v1823_v59 = vrot.slane %v1815_v39, %v4125_v27 }
 0x430   : > { %3523 = vmatmul.mubr.msk.bf16.vlgmr.msra.gmra.mxu0 %vm1234_vm3, %v1464_v53  ;;  %v1847_v63 = vcombine.low %v1823_v59, %v1839_v57  ;;  %v1848_v0 = vcombine.high %v1823_v59, %v1839_v57 }
 0x431   : > { %3533 = vmatpush3.bf16.msra.mxu0 %v1610_v54  ;;  %3534 = vmatprep.mubr.msk.bf16.mxu0 %vm3869_vm1, %v3868_v3 }
 0x432   : > { %3544 = vmatprep.subr.bf16.mxu0 %v3868_v3  ;;  %v1855_v11 = vrot.slane %v1847_v63, %v4135_v37  ;;  %v1862_v12 = vrot.slane %v1848_v0, %v4135_v37 }
 0x434   : > { %v1883_v28 = vcombine.low %v1855_v11, %v1862_v12  ;;  %v3392_v29 = vcombine.high %v1855_v11, %v1862_v12  ;;  %v1932_v12 = vcombine.high %v1906_v46, %v1914_v47 }
 0x436   : > { %v1890_v44 = vrot.slane %v1883_v28, %v4125_v27  ;;  %v1898_v45 = vrot.slane %v3392_v29, %v4125_v27 }
 0x438   : > { %v1915_v57 = vcombine.low %v1890_v44, %v1898_v45 }
 0x43a   : > { %v1454_v62 = vpop.xlane.xlu1 %1453  ;;  %v1923_v0 = vrot.slane %v1915_v57, %v4135_v37 }
 0x43b   : > { %3722 = vrcp.f32 %v1454_v62 }
 0x43c   : > { %v1948_v11 = vcombine.high %v1923_v0, %v1939_v1 }
 0x43e   : > { %v1962_v6 = vpop.permute.xlu1 %1961 }
 0x43f   : > { %v1983_v8 = vcombine.low %v1958_v48, %v1962_v6  ;;  %v1984_v9 = vcombine.high %v1958_v48, %v1962_v6 }
 0x441   : > { %v1991_v21 = vrot.slane %v1983_v8, %v4125_v27  ;;  %v1998_v22 = vrot.slane %v1984_v9, %v4125_v27  ;;  %v1916_v8 = vcombine.high %v1890_v44, %v1898_v45  ;;  %v1947_v9 = vcombine.low %v1923_v0, %v1939_v1 }
 0x443   : > { %v1999_v23 = vcombine.low %v1975_v19, %v1991_v21  ;;  %v2000_v24 = vcombine.high %v1975_v19, %v1991_v21  ;;  %v2015_v25 = vcombine.low %v1982_v20, %v1998_v22  ;;  %v2016_v26 = vcombine.high %v1982_v20, %v1998_v22 }
 0x444   : > { %v1951_v19 = vpack.c.bf16 %v1947_v9, %v1947_v9  ;;  %v1952_v20 = vpack.c.bf16 %v1948_v11, %v1948_v11  ;;  %v1930_v21 = vrot.slane %v1916_v8, %v4135_v37  ;;  %v1946_v22 = vrot.slane %v1932_v12, %v4135_v37 }
 0x445   : > { %v2007_v31 = vrot.slane %v1999_v23, %v4135_v37  ;;  %v2014_v17 = vrot.slane %v2000_v24, %v4135_v37  ;;  %v2023_v32 = vrot.slane %v2015_v25, %v4135_v37  ;;  %v2030_v15 = vrot.slane %v2016_v26, %v4135_v37 }
 0x446   : > { %v1949_v25 = vcombine.low %v1930_v21, %v1946_v22  ;;  %v1950_v26 = vcombine.high %v1930_v21, %v1946_v22 }
 0x447   : > { %v2035_v16 = vcombine.low %v2007_v31, %v2014_v17  ;;  %v3394_v36 = vcombine.high %v2007_v31, %v2014_v17  ;;  %v2051_v38 = vcombine.low %v2023_v32, %v2030_v15  ;;  %v3395_v41 = vcombine.high %v2023_v32, %v2030_v15 }
 0x448   : > { %v3723_v43 = vpop.eup %3722  ;;  %v1953_v28 = vpack.c.bf16 %v1949_v25, %v1949_v25  ;;  %v1954_v29 = vpack.c.bf16 %v1950_v26, %v1950_v26 }
 0x449   : > { %v2042_v48 = vrot.slane %v2035_v16, %v4125_v27  ;;  %v2050_v49 = vrot.slane %v3394_v36, %v4125_v27  ;;  %v2058_v34 = vrot.slane %v2051_v38, %v4125_v27  ;;  %v2066_v50 = vrot.slane %v3395_v41, %v4125_v27 }
 0x44a   : > { %v1462_v51 = vmul.f32 %v3723_v43, %v4235_v7 }
 0x44b   : > { %v2067_v52 = vcombine.low %v2042_v48, %v2050_v49  ;;  %v2083_v53 = vcombine.low %v2058_v34, %v2066_v50  ;;  %v2068_v54 = vcombine.high %v2042_v48, %v2050_v49  ;;  %v2084_v35 = vcombine.high %v2058_v34, %v2066_v50 }
 0x44c   : > { %v1466_v55 = vpack.c.bf16 %v1462_v51, %v1462_v51 }
 0x44d   : > { %v2075_v39 = vrot.slane %v2067_v52, %v4135_v37  ;;  %v2091_v56 = vrot.slane %v2083_v53, %v4135_v37  ;;  %v2082_v7 = vrot.slane %v2068_v54, %v4135_v37  ;;  %v2098_v61 = vrot.slane %v2084_v35, %v4135_v37 }
 0x44e   : > { %3535 = vmatmul.mubr.msk.bf16.vlgmr.msra.gmra.mxu0 %vm1234_vm3, %v1466_v55 }
 0x44f   : > { %v2099_v59 = vcombine.low %v2075_v39, %v2091_v56  ;;  %v2100_v60 = vcombine.high %v2075_v39, %v2091_v56  ;;  %3546 = vmatprep.mubr.msk.bf16.mxu0 %vm3869_vm1, %v3868_v3  ;;  %v2101_v5 = vcombine.low %v2082_v7, %v2098_v61  ;;  %v2102_v6 = vcombine.high %v2082_v7, %v2098_v61 }
 0x451   : > { %v2103_v62 = vpack.c.bf16 %v2099_v59, %v2099_v59  ;;  %v2104_v63 = vpack.c.bf16 %v2100_v60, %v2100_v60  ;;  %v2105_v14 = vpack.c.bf16 %v2101_v5, %v2101_v5  ;;  %v2106_v18 = vpack.c.bf16 %v2102_v6, %v2102_v6  ;;  %v3398_v6 = vld [vmem:[#allocation6 + $0x1] ss:$0 sm:$0xff] }
 0x453   : > { %v2271_v2 = vsel %vm1234_vm3, %v2103_v62, 0  ;;  %v2317_v4 = vsel %vm1234_vm3, %v2104_v63, 0  ;;  %v2363_v23 = vsel %vm1234_vm3, %v2105_v14, 0  ;;  %v2409_v24 = vsel %vm1234_vm3, %v2106_v18, 0 }
 0x454   : > { %3539 = vmatpush3.bf16.xpose.msra.mxu1 %v2271_v2  ;;  %3545 = vmatpush3.bf16.xpose.msra.mxu0 %v2317_v4 }
 0x455   : > { %3550 = vmatprep.subr.bf16.mxu1 %v3868_v3  ;;  %3556 = vmatprep.subr.bf16.mxu0 %v3868_v3 }
 0x45b   : > { %3541 = vmatmul.mubr.msk.bf16.vlgmr.msra.gmra.mxu1 %vm1234_vm3, %v1951_v19  ;;  %3547 = vmatmul.mubr.msk.bf16.vlgmr.msra.gmra.mxu0 %vm1234_vm3, %v1952_v20 }
 0x45c   : > { %3551 = vmatpush3.bf16.xpose.msra.mxu1 %v2363_v23  ;;  %3557 = vmatpush3.bf16.xpose.msra.mxu0 %v2409_v24 }
 0x45d   : > { %3552 = vmatprep.mubr.msk.bf16.mxu1 %vm3869_vm1, %v3868_v3  ;;  %3558 = vmatprep.mubr.msk.bf16.mxu0 %vm3869_vm1, %v3868_v3 }
 0x45e   : > { %3562 = vmatprep.subr.bf16.mxu1 %v3868_v3  ;;  %3568 = vmatprep.subr.bf16.mxu0 %v3868_v3 }
 0x463   : > { %3553 = vmatmul.mubr.msk.bf16.vlgmr.msra.gmra.mxu1 %vm1234_vm3, %v1953_v28  ;;  %3559 = vmatmul.mubr.msk.bf16.vlgmr.msra.gmra.mxu0 %vm1234_vm3, %v1954_v29 }
 0x464   : > { %3564 = vmatprep.mubr.msk.bf16.mxu1 %vm3869_vm1, %v3868_v3  ;;  %3570 = vmatprep.mubr.msk.bf16.mxu0 %vm3869_vm1, %v3868_v3 }
 0x4d3   : > { %v1508_v30 = vpop.f32.mrf.mxu1 }
 0x4d5   : > { %v3518_v10 = vpop.f32.mrf.mxu1 }
 0x4d7   : > { %v1511_v31 = vpop.f32.mrf.mxu1 }
 0x4d9   : > { %v3519_v17 = vpop.f32.mrf.mxu1 }
 0x4db   : > { %v1600_v32 = vpop.f32.mrf.mxu1 }
 0x4dc   : > { %v1652_v15 = vcombine.low %v1508_v30, %v1600_v32  ;;  %v1653_v16 = vcombine.high %v1508_v30, %v1600_v32 }
 0x4dd   : > { %v3530_v36 = vpop.f32.mrf.mxu1 }
 0x4de   : > { %v1660_v50 = vrot.slane %v1652_v15, %v4125_v27  ;;  %v1667_v51 = vrot.slane %v1653_v16, %v4125_v27 }
 0x4df   : > { %v1603_v38 = vpop.f32.mrf.mxu1 }
 0x4e1   : > { %v3531_v41 = vpop.f32.mrf.mxu1 }
 0x4f0   : > { %v1554_v43 = vpop.f32.mrf.mxu0 }
 0x4f2   : > { %v3524_v44 = vpop.f32.mrf.mxu0 }
 0x4f4   : > { %v1557_v45 = vpop.f32.mrf.mxu0 }
 0x4f6   : > { %v3525_v46 = vpop.f32.mrf.mxu0 }
 0x50e   : > { %v1646_v47 = vpop.f32.mrf.mxu0 }
 0x50f   : > { %v1668_v48 = vcombine.low %v1554_v43, %v1646_v47  ;;  %v1669_v49 = vcombine.high %v1554_v43, %v1646_v47 }
 0x510   : > { %v3536_v34 = vpop.f32.mrf.mxu0 }
 0x511   : > { %v1676_v52 = vrot.slane %v1668_v48, %v4125_v27  ;;  %v1683_v53 = vrot.slane %v1669_v49, %v4125_v27 }
 0x512   : > { %v1649_v54 = vpop.f32.mrf.mxu0 }
 0x513   : > { %v1684_v35 = vcombine.low %v1660_v50, %v1676_v52  ;;  %v1685_v55 = vcombine.high %v1660_v50, %v1676_v52  ;;  %v1700_v39 = vcombine.low %v1667_v51, %v1683_v53  ;;  %v1701_v56 = vcombine.high %v1667_v51, %v1683_v53 }
 0x514   : > { %v3537_v57 = vpop.f32.mrf.mxu0 }
 0x515   : > { %v1692_v58 = vrot.slane %v1684_v35, %v4135_v37  ;;  %v1699_v59 = vrot.slane %v1685_v55, %v4135_v37  ;;  %v1708_v60 = vrot.slane %v1700_v39, %v4135_v37  ;;  %v1715_v7 = vrot.slane %v1701_v56, %v4135_v37 }
 0x517   : > { %v1720_v61 = vcombine.low %v1692_v58, %v1699_v59  ;;  %v3390_v62 = vcombine.high %v1692_v58, %v1699_v59  ;;  %v1736_v63 = vcombine.low %v1708_v60, %v1715_v7  ;;  %v3391_v0 = vcombine.high %v1708_v60, %v1715_v7 }
 0x519   : > { %v1727_v1 = vrot.slane %v1720_v61, %v4125_v27  ;;  %v1735_v2 = vrot.slane %v3390_v62, %v4125_v27  ;;  %v1743_v4 = vrot.slane %v1736_v63, %v4125_v27  ;;  %v1751_v5 = vrot.slane %v3391_v0, %v4125_v27 }
 0x51b   : > { %v2307_v8 = vpop.f32.mrf.mxu1  ;;  %v2353_v9 = vpop.f32.mrf.mxu0  ;;  %v1753_v11 = vcombine.high %v1727_v1, %v1735_v2  ;;  %v1769_v12 = vcombine.high %v1743_v4, %v1751_v5  ;;  %v1752_v14 = vcombine.low %v1727_v1, %v1735_v2  ;;  %v1768_v18 = vcombine.low %v1743_v4, %v1751_v5 }
 0x51c   : > { %v2308_v19 = vadd.f32 %v3398_v6, %v2307_v8  ;;  %v2354_v20 = vadd.f32 %v3398_v6, %v2353_v9 }
 0x51d   : > { %v3542_v21 = vpop.f32.mrf.mxu1  ;;  %v3548_v22 = vpop.f32.mrf.mxu0  ;;  %v4346_v23 = vrot.slane %v1753_v11, %v4135_v37  ;;  %v4349_v24 = vrot.slane %v1769_v12, %v4135_v37  ;;  %v4352_v25 = vrot.slane %v1752_v14, %v4135_v37  ;;  %v4355_v26 = vrot.slane %v1768_v18, %v4135_v37 }
 0x51e   : > { %v2451_v28 = vsel %vm1234_vm3, %v2308_v19, -inf  ;;  %v2454_v29 = vsel %vm1234_vm3, %v2354_v20, -inf }
 0x51f   : > { %2452 = vmax.xlane.f32.xlu0 %v2451_v28  ;;  %v2310_v30 = vpop.f32.mrf.mxu1  ;;  %2455 = vmax.xlane.f32.xlu1 %v2454_v29  ;;  %v2356_v10 = vpop.f32.mrf.mxu0  ;;  %v1786_v31 = vcombine.low %v4346_v23, %v4349_v24  ;;  %v1784_v17 = vcombine.low %v4352_v25, %v4355_v26  ;;  %v1785_v32 = vcombine.high %v4352_v25, %v4355_v26  ;;  %v3409_v25 = vld [vmem:[%s4591_s4] ss:$0 sm:$0xff] }
 0x520   : > { %v1787_v15 = vcombine.high %v4346_v23, %v4349_v24 }
 0x521   : > { %v3543_v16 = vpop.f32.mrf.mxu1  ;;  %v3549_v36 = vpop.f32.mrf.mxu0 }
 0x523   : > { %v2399_v38 = vpop.f32.mrf.mxu1  ;;  %v2445_v41 = vpop.f32.mrf.mxu0 }
 0x524   : > { %v2400_v43 = vadd.f32 %v3398_v6, %v2399_v38  ;;  %v2446_v46 = vadd.f32 %v3398_v6, %v2445_v41 }
 0x525   : > { %v3554_v44 = vpop.f32.mrf.mxu1  ;;  %v3560_v45 = vpop.f32.mrf.mxu0 }
 0x526   : > { %v2457_v47 = vsel %vm1234_vm3, %v2400_v43, -inf  ;;  %v2460_v51 = vsel %vm1234_vm3, %v2446_v46, -inf }
 0x527   : > { %2458 = vmax.xlane.f32.xlu0 %v2457_v47  ;;  %v2402_v48 = vpop.f32.mrf.mxu1  ;;  %v2448_v49 = vpop.f32.mrf.mxu0 }
 0x529   : > { %v3555_v34 = vpop.f32.mrf.mxu1  ;;  %v3561_v50 = vpop.f32.mrf.mxu0 }
 0x52b   : > { %2461 = vmax.xlane.f32.xlu0 %v2460_v51 }
 0x530   : > { %2107 = vrot.lane.b32.xlu1 %v4103_v13, %s3876_s0 }
 0x5a8   : > { %v2453_v52 = vpop.xlane.xlu0 %2452  ;;  %v2456_v53 = vpop.xlane.xlu1 %2455 }
 0x5a9   : > { %v2463_v54 = vsub.f32 %v2308_v19, %v2453_v52  ;;  %v2464_v35 = vsub.f32 %v2354_v20, %v2456_v53 }
 0x5ab   : > { %v2467_v55 = vmul.f32 1.442695, %v2463_v54  ;;  %v2469_v39 = vmul.f32 1.442695, %v2464_v35 }
 0x5ad   : > { %3724 = vpow2.f32 %v2467_v55 }
 0x5ae   : > { %3726 = vpow2.f32 %v2469_v39 }
 0x5b0   : > { %v2459_v13 = vpop.xlane.xlu0 %2458 }
 0x5b1   : > { %v2465_v60 = vsub.f32 %v2400_v43, %v2459_v13 }
 0x5b3   : > { %v2471_v62 = vmul.f32 1.442695, %v2465_v60 }
 0x5b4   : > { %v2462_v7 = vpop.xlane.xlu0 %2461 }
 0x5b5   : > { %v2466_v61 = vsub.f32 %v2446_v46, %v2462_v7  ;;  %3728 = vpow2.f32 %v2471_v62 }
 0x5b7   : > { %v2473_v63 = vmul.f32 1.442695, %v2466_v61 }
 0x5b9   : > { %3730 = vpow2.f32 %v2473_v63 }
 0x5ba   : > { %v4371_v56 = vpop.eup %3724 }
 0x5bb   : > { %v4373_v57 = vpop.eup %3726  ;;  %v2475_v58 = vsel %vm1234_vm3, %v4371_v56, 0.0 }
 0x5bc   : > { %2476 = vadd.xlane.f32.xlu1 %v2475_v58  ;;  %v2478_v59 = vsel %vm1234_vm3, %v4373_v57, 0.0 }
 0x5bd   : > { %2479 = vadd.xlane.f32.xlu0 %v2478_v59 }
 0x5c2   : > { %v4385_v0 = vpop.eup %3728 }
 0x5c6   : > { %v4387_v1 = vpop.eup %3730 }
 0x5cd   : > { %2111 = vrot.lane.b32.xlu1 %v4219_v40, %s3876_s0  ;;  %v2481_v40 = vsel %vm1234_vm3, %v4385_v0, 0.0 }
 0x5d1   : > { %2113 = vrot.lane.b32.xlu1 %v4225_v42, %s3876_s0  ;;  %v2484_v42 = vsel %vm1234_vm3, %v4387_v1, 0.0 }
 0x5d3   : > { %2109 = vrot.lane.b32.xlu0 %v4205_v33, %s3876_s0  ;;  %v2108_v33 = vpop.permute.xlu1 %2107 }
 0x5f2   : > { %2482 = vadd.xlane.f32.xlu0 %v2481_v40 }
 0x5f5   : > { %2485 = vadd.xlane.f32.xlu1 %v2484_v42 }
 0x645   : > { %v2477_v2 = vpop.xlane.xlu1 %2476 }
 0x646   : > { %v2480_v4 = vpop.xlane.xlu0 %2479  ;;  %3732 = vrcp.f32 %v2477_v2 }
 0x647   : > { %3734 = vrcp.f32 %v2480_v4 }
 0x649   : > { %v2112_v5 = vpop.permute.xlu1 %2111 }
 0x64a   : > { %v2119_v6 = vcombine.low %v2108_v33, %v2112_v5  ;;  %v2120_v8 = vcombine.high %v2108_v33, %v2112_v5  ;;  %v2110_v9 = vpop.permute.xlu0 %2109 }
 0x64c   : > { %v2127_v18 = vrot.slane %v2119_v6, %v4125_v27  ;;  %v2134_v19 = vrot.slane %v2120_v8, %v4125_v27 }
 0x64d   : > { %v2114_v11 = vpop.permute.xlu1 %2113 }
 0x64e   : > { %v2135_v12 = vcombine.low %v2110_v9, %v2114_v11  ;;  %v2136_v14 = vcombine.high %v2110_v9, %v2114_v11 }
 0x650   : > { %v2143_v20 = vrot.slane %v2135_v12, %v4125_v27  ;;  %v2150_v21 = vrot.slane %v2136_v14, %v4125_v27 }
 0x652   : > { %v2151_v22 = vcombine.low %v2127_v18, %v2143_v20  ;;  %v2152_v28 = vcombine.high %v2127_v18, %v2143_v20  ;;  %v2167_v29 = vcombine.low %v2134_v19, %v2150_v21  ;;  %v2168_v30 = vcombine.high %v2134_v19, %v2150_v21 }
 0x653   : > { %v3733_v53 = vpop.eup %3732 }
 0x654   : > { %v2159_v10 = vrot.slane %v2151_v22, %v4135_v37  ;;  %v2166_v16 = vrot.slane %v2152_v28, %v4135_v37  ;;  %v2175_v36 = vrot.slane %v2167_v29, %v4135_v37  ;;  %v2182_v38 = vrot.slane %v2168_v30, %v4135_v37  ;;  %v3735_v54 = vpop.eup %3734 }
 0x655   : > { %v2491_v63 = vmul.f32 %v3733_v53, %v4371_v56  ;;  %v2492_v40 = vmul.f32 %v3735_v54, %v4373_v57 }
 0x656   : > { %v2187_v41 = vcombine.low %v2159_v10, %v2166_v16  ;;  %v3396_v43 = vcombine.high %v2159_v10, %v2166_v16  ;;  %v2203_v44 = vcombine.low %v2175_v36, %v2182_v38  ;;  %v3397_v45 = vcombine.high %v2175_v36, %v2182_v38 }
 0x657   : > { %v2495_v5 = vpack.c.bf16 %v2491_v63, %v2491_v63  ;;  %v2496_v6 = vpack.c.bf16 %v2492_v40, %v2492_v40  ;;  %v3700_v40 = vld [vmem:[%s4039_s28 + $0x8] sm:$0xff]  }
 0x658   : > { %v2194_v46 = vrot.slane %v2187_v41, %v4125_v27  ;;  %v2202_v47 = vrot.slane %v3396_v43, %v4125_v27  ;;  %v2210_v48 = vrot.slane %v2203_v44, %v4125_v27  ;;  %v2218_v49 = vrot.slane %v3397_v45, %v4125_v27 }
 0x65a   : > { %v2219_v34 = vcombine.low %v2194_v46, %v2202_v47  ;;  %v2235_v50 = vcombine.low %v2210_v48, %v2218_v49  ;;  %v2220_v51 = vcombine.high %v2194_v46, %v2202_v47  ;;  %v2236_v52 = vcombine.high %v2210_v48, %v2218_v49 }
 0x65c   : > { %v2227_v35 = vrot.slane %v2219_v34, %v4135_v37  ;;  %v2243_v55 = vrot.slane %v2235_v50, %v4135_v37  ;;  %v2234_v39 = vrot.slane %v2220_v51, %v4135_v37  ;;  %v2250_v58 = vrot.slane %v2236_v52, %v4135_v37 }
 0x65e   : > { %v2251_v59 = vcombine.low %v2227_v35, %v2243_v55  ;;  %v2252_v13 = vcombine.high %v2227_v35, %v2243_v55  ;;  %v2253_v60 = vcombine.low %v2234_v39, %v2250_v58  ;;  %v2254_v7 = vcombine.high %v2234_v39, %v2250_v58 }
 0x660   : > { %v2255_v61 = vpack.c.bf16 %v2251_v59, %v2251_v59  ;;  %v2256_v62 = vpack.c.bf16 %v2252_v13, %v2252_v13  ;;  %v2257_v2 = vpack.c.bf16 %v2253_v60, %v2253_v60  ;;  %v2258_v4 = vpack.c.bf16 %v2254_v7, %v2254_v7 }
 0x662   : > { %v2503_v42 = vsel %vm1470_vm4, %v2255_v61, 0  ;;  %v2549_v33 = vsel %vm1470_vm4, %v2256_v62, 0  ;;  %v2595_v56 = vsel %vm1470_vm4, %v2257_v2, 0  ;;  %v2641_v57 = vsel %vm1470_vm4, %v2258_v4, 0 }
 0x663   : > { %3563 = vmatpush3.bf16.msra.mxu1 %v2503_v42  ;;  %3569 = vmatpush3.bf16.msra.mxu0 %v2549_v33 }
 0x664   : > { %3574 = vmatprep.subr.bf16.mxu1 %v3868_v3  ;;  %3580 = vmatprep.subr.bf16.mxu0 %v3868_v3 }
 0x666   : > { %3565 = vmatmul.mubr.msk.bf16.vlgmr.msra.gmra.mxu1 %vm1234_vm3, %v2495_v5  ;;  %3571 = vmatmul.mubr.msk.bf16.vlgmr.msra.gmra.mxu0 %vm1234_vm3, %v2496_v6 }
 0x667   : > { %3575 = vmatpush3.bf16.msra.mxu1 %v2595_v56  ;;  %3581 = vmatpush3.bf16.msra.mxu0 %v2641_v57 }
 0x668   : > { %3576 = vmatprep.mubr.msk.bf16.mxu1 %vm3869_vm1, %v3868_v3  ;;  %3582 = vmatprep.mubr.msk.bf16.mxu0 %vm3869_vm1, %v3868_v3 }
 0x669   : > { %3586 = vmatprep.subr.bf16.mxu1 %v3868_v3  ;;  %3594 = vmatprep.subr.bf16.mxu0 %v3868_v3 }
 0x67b   : > { %v2483_v8 = vpop.xlane.xlu0 %2482 }
 0x67c   : > { %3736 = vrcp.f32 %v2483_v8  ;;  %v3701_v8 = vld [vmem:[%s4039_s28] sm:$0xff]   ;;  %s3877_s28 = smov 16  }
 0x67e   : > { %v2486_v9 = vpop.xlane.xlu1 %2485 }
 0x67f   : > { %3738 = vrcp.f32 %v2486_v9 }
 0x689   : > { %v3737_v11 = vpop.eup %3736 }
 0x68a   : > { %v2493_v12 = vmul.f32 %v3737_v11, %v4385_v0 }
 0x68c   : > { %v3739_v14 = vpop.eup %3738  ;;  %v2497_v18 = vpack.c.bf16 %v2493_v12, %v2493_v12 }
 0x68d   : > { %v2494_v19 = vmul.f32 %v3739_v14, %v4387_v1 }
 0x68e   : > { %3577 = vmatmul.mubr.msk.bf16.vlgmr.msra.gmra.mxu1 %vm1234_vm3, %v2497_v18 }
 0x68f   : > { %v2498_v20 = vpack.c.bf16 %v2494_v19, %v2494_v19  ;;  %3590 = vmatprep.mubr.msk.bf16.mxu1 %vm3869_vm1, %v3868_v3  ;;  %3587 = vmatpush3.bf16.msra.mxu1 %v3700_v40 }
 0x690   : > { %3588 = vmatprep.subr.bf16.mxu1 %v3868_v3 }
 0x691   : > { %3583 = vmatmul.mubr.msk.bf16.vlgmr.msra.gmra.mxu0 %vm1234_vm3, %v2498_v20 }
 0x692   : > { %3598 = vmatprep.mubr.msk.bf16.mxu0 %vm3869_vm1, %v3868_v3 }
 0x693   : > { %3589 = vmatpush3.bf16.msra.mxu1 %v3701_v8 }
 0x694   : > { %3602 = vmatprep.subr.bf16.mxu1 %v3868_v3 }
 0x726   : > { %v2539_v21 = vpop.f32.mrf.mxu1  ;;  %v2585_v22 = vpop.f32.mrf.mxu0 }
 0x728   : > { %v3566_v28 = vpop.f32.mrf.mxu1  ;;  %v3572_v29 = vpop.f32.mrf.mxu0 }
 0x72a   : > { %v2542_v0 = vpop.f32.mrf.mxu1  ;;  %v2588_v30 = vpop.f32.mrf.mxu0 }
 0x72c   : > { %v3567_v10 = vpop.f32.mrf.mxu1  ;;  %v3573_v16 = vpop.f32.mrf.mxu0 }
 0x74e   : > { %v2631_v1 = vpop.f32.mrf.mxu1 }
 0x74f   : > { %v2683_v36 = vcombine.low %v2539_v21, %v2631_v1  ;;  %v2684_v38 = vcombine.high %v2539_v21, %v2631_v1 }
 0x750   : > { %v3578_v41 = vpop.f32.mrf.mxu1 }
 0x751   : > { %v2677_v43 = vpop.f32.mrf.mxu0  ;;  %v2691_v48 = vrot.slane %v2683_v36, %v4125_v27  ;;  %v2698_v49 = vrot.slane %v2684_v38, %v4125_v27 }
 0x752   : > { %v2634_v44 = vpop.f32.mrf.mxu1  ;;  %v2699_v45 = vcombine.low %v2585_v22, %v2677_v43  ;;  %v2700_v46 = vcombine.high %v2585_v22, %v2677_v43 }
 0x753   : > { %v3584_v47 = vpop.f32.mrf.mxu0 }
 0x754   : > { %v2707_v34 = vrot.slane %v2699_v45, %v4125_v27  ;;  %v2714_v50 = vrot.slane %v2700_v46, %v4125_v27  ;;  %v3579_v51 = vpop.f32.mrf.mxu1  ;;  %v3748_v45 = vld [vmem:[#allocation2] sm:$0xff] }
 0x755   : > { %v2680_v52 = vpop.f32.mrf.mxu0 }
 0x756   : > { %v2715_v53 = vcombine.low %v2691_v48, %v2707_v34  ;;  %v2716_v54 = vcombine.high %v2691_v48, %v2707_v34  ;;  %v2731_v35 = vcombine.low %v2698_v49, %v2714_v50  ;;  %v2732_v55 = vcombine.high %v2698_v49, %v2714_v50  ;;  %v3749_v50 = vld [vmem:[#allocation2 + $0x8] sm:$0xff] }
 0x757   : > { %v3585_v39 = vpop.f32.mrf.mxu0 }
 0x758   : > { %v2723_v58 = vrot.slane %v2715_v53, %v4135_v37  ;;  %v2730_v59 = vrot.slane %v2716_v54, %v4135_v37  ;;  %v2739_v13 = vrot.slane %v2731_v35, %v4135_v37  ;;  %v2746_v60 = vrot.slane %v2732_v55, %v4135_v37 }
 0x75a   : > { %v2751_v7 = vcombine.low %v2723_v58, %v2730_v59  ;;  %v3407_v61 = vcombine.high %v2723_v58, %v2730_v59  ;;  %v2767_v62 = vcombine.low %v2739_v13, %v2746_v60  ;;  %v3408_v63 = vcombine.high %v2739_v13, %v2746_v60 }
 0x75c   : > { %v2758_v42 = vrot.slane %v2751_v7, %v4125_v27  ;;  %v2766_v33 = vrot.slane %v3407_v61, %v4125_v27  ;;  %v2774_v2 = vrot.slane %v2767_v62, %v4125_v27  ;;  %v2782_v4 = vrot.slane %v3408_v63, %v4125_v27  ;;  %v3702_v61 = vld [vmem:[%s4056_s22 + $0x8] sm:$0xff]   ;;  %v3703_v62 = vld [vmem:[%s4056_s22] sm:$0xff]   ;;  %v3704_v63 = vld [vmem:[%s4066_s25 + $0x18] sm:$0xff]  }
 0x75d   : > { %3595 = vmatpush3.bf16.msra.mxu0 %v3702_v61 }
 0x75e   : > { %v2784_v5 = vcombine.high %v2758_v42, %v2766_v33  ;;  %v2800_v6 = vcombine.high %v2774_v2, %v2782_v4  ;;  %v2783_v56 = vcombine.low %v2758_v42, %v2766_v33  ;;  %v2799_v57 = vcombine.low %v2774_v2, %v2782_v4  ;;  %3596 = vmatprep.subr.bf16.mxu0 %v3868_v3 }
 0x760   : > { %v2798_v9 = vrot.slane %v2784_v5, %v4135_v37  ;;  %v2814_v11 = vrot.slane %v2800_v6, %v4135_v37  ;;  %v2791_v12 = vrot.slane %v2783_v56, %v4135_v37  ;;  %v2807_v14 = vrot.slane %v2799_v57, %v4135_v37  ;;  %v3413_v57 = vld [vmem:[%s4592_s18] ss:$0 sm:$0xff] }
 0x761   : > { %3597 = vmatpush3.bf16.msra.mxu0 %v3703_v62 }
 0x762   : > { %v2817_v18 = vcombine.low %v2798_v9, %v2814_v11  ;;  %v2816_v19 = vcombine.high %v2791_v12, %v2807_v14  ;;  %v2815_v27 = vcombine.low %v2791_v12, %v2807_v14  ;;  %v2818_v22 = vcombine.high %v2798_v9, %v2814_v11  ;;  %v3414_v12 = vld [vmem:[%s4593_s20] ss:$0 sm:$0xff] }
 0x764   : > { %v3688_v20 = vpack.i.bf16 %v2817_v18, %v1786_v31  ;;  %v3683_v21 = vpack.i.bf16 %v2816_v19, %v1785_v32  ;;  %v3693_v37 = vpack.i.bf16 %v2818_v22, %v1787_v15  ;;  %v3707_v22 = vld [vmem:[%s4066_s25] sm:$0xff]  }
 0x766   : > { %3689 = vrot.lane.b32.xlu1 %v3688_v20, %s3877_s28  ;;  %3684 = vrot.lane.b32.xlu0 %v3683_v21, %s3878_s1  ;;  %v3705_v20 = vld [vmem:[%s4066_s25 + $0x10] sm:$0xff]   ;;  %v3706_v21 = vld [vmem:[%s4066_s25 + $0x8] sm:$0xff]  }
 0x76a   : > { %3694 = vrot.lane.b32.xlu0 %v3693_v37, %s3879_s17  ;;  %v3415_v37 = vld [vmem:[%s676_s2] ss:$0 sm:$0xff] }
 0x7d8   : > { %v3690_v28 = vpop.permute.xlu1 %3689  ;;  %v3685_v29 = vpop.permute.xlu0 %3684 }
 0x7d9   : > { %v3687_v0 = vunpack.i.h.bf16 %v3685_v29  ;;  %v3686_v31 = vunpack.i.l.bf16 %v3685_v29  ;;  %v3692_v30 = vunpack.i.h.bf16 %v3690_v28  ;;  %v3691_v10 = vunpack.i.l.bf16 %v3690_v28 }
 0x7db   : > { %v1800_v32 = vsel %vm1234_vm3, %v1784_v17, %v3686_v31  ;;  %v2831_v16 = vsel %vm1234_vm3, %v2815_v27, %v3687_v0 }
 0x7dc   : > { %v3695_v23 = vpop.permute.xlu0 %3694  ;;  %v1802_v1 = vsel %vm1801_vm5, %v1800_v32, %v3691_v10  ;;  %v2832_v36 = vsel %vm1801_vm5, %v2831_v16, %v3692_v30 }
 0x7dd   : > { %v3697_v24 = vunpack.i.h.bf16 %v3695_v23  ;;  %v3696_v15 = vunpack.i.l.bf16 %v3695_v23 }
 0x7df   : > { %v1804_v38 = vsel %vm1803_vm6, %v1802_v1, %v3696_v15  ;;  %v2833_v41 = vsel %vm1803_vm6, %v2832_v36, %v3697_v24 }
 0x7e0   : > { %v2834_v43 = vpack.c.bf16 %v2833_v41, %v1804_v38 }
 0x7e2   : > { %3591 = vmatmul.mubr.msk.bf16.vlgmr.msra.gmra.mxu1 %vm728_vm2, %v2834_v43 }
 0x7e3   : > { %3610 = vmatprep.mubr.msk.bf16.mxu1 %vm3869_vm1, %v3868_v3  ;;  %3603 = vmatpush3.bf16.msra.mxu1 %v3704_v63 }
 0x7e4   : > { %3604 = vmatprep.subr.bf16.mxu1 %v3868_v3 }
 0x7e7   : > { %3605 = vmatpush3.bf16.msra.mxu1 %v3705_v20 }
 0x7e8   : > { %3606 = vmatprep.subr.bf16.mxu1 %v3868_v3 }
 0x7eb   : > { %3607 = vmatpush3.bf16.msra.mxu1 %v3706_v21 }
 0x7ec   : > { %3608 = vmatprep.subr.bf16.mxu1 %v3868_v3  ;;  %v3419_v3 = vld [vmem:[%s684_s15] ss:$0 sm:$0xff] }
 0x7ef   : > { %3609 = vmatpush3.bf16.msra.mxu1 %v3707_v22 }
 0x8a2   : > { %v2895_v26 = vpop.f32.mrf.mxu1 }
 0x8a3   : > { %v2896_v17 = vadd.f32 %v3409_v25, %v2895_v26 }
 0x8a4   : > { %v3592_v44 = vpop.f32.mrf.mxu1 }
 0x8a5   : > { %v2902_v46 = vadd.f32 %v3748_v45, %v2896_v17 }
 0x8a6   : > { %v2898_v47 = vpop.f32.mrf.mxu1 }
 0x8a7   : > { %v2899_v48 = vadd.f32 %v3409_v25, %v2898_v47  ;;  %v2906_v49 = vsel %vm728_vm2, %v2902_v46, 0.0 }
 0x8a8   : > { %2907 = vadd.xlane.f32.xlu1 %v2906_v49  ;;  %v3593_v34 = vpop.f32.mrf.mxu1 }
 0x8a9   : > { %v2903_v51 = vadd.f32 %v3749_v50, %v2899_v48 }
 0x8ab   : > { %v2909_v52 = vsel %vm728_vm2, %v2903_v51, 0.0 }
 0x8ac   : > { %2910 = vadd.xlane.f32.xlu0 %v2909_v52 }
 0x931   : > { %v2908_v53 = vpop.xlane.xlu1 %2907 }
 0x932   : > { %v2913_v54 = vmul.f32 0.03125, %v2908_v53 }
 0x934   : > { %v2915_v35 = vsub.f32 %v2902_v46, %v2913_v54 }
 0x935   : > { %v2911_v55 = vpop.xlane.xlu0 %2910 }
 0x936   : > { %v2914_v39 = vmul.f32 0.03125, %v2911_v55  ;;  %v2917_v58 = vmul.f32 %v2915_v35, %v2915_v35 }
 0x938   : > { %v2916_v59 = vsub.f32 %v2903_v51, %v2914_v39  ;;  %v2919_v13 = vsel %vm728_vm2, %v2917_v58, 0.0 }
 0x939   : > { %2920 = vadd.xlane.f32.xlu0 %v2919_v13  ;;  %v3425_v13 = vld [vmem:[%s687_s19] ss:$0 sm:$0xff] }
 0x93a   : > { %v2918_v60 = vmul.f32 %v2916_v59, %v2916_v59 }
 0x93c   : > { %v2922_v7 = vsel %vm728_vm2, %v2918_v60, 0.0 }
 0x93d   : > { %2923 = vadd.xlane.f32.xlu1 %v2922_v7  ;;  %v3426_v7 = vld [vmem:[%s690_s14] ss:$0 sm:$0xff] }
 0x9c2   : > { %v2921_v40 = vpop.xlane.xlu0 %2920 }
 0x9c3   : > { %v2925_v42 = vmul.f32 0.03125, %v2921_v40 }
 0x9c5   : > { %v2927_v33 = vadd.f32 1e-05, %v2925_v42 }
 0x9c6   : > { %v2924_v2 = vpop.xlane.xlu1 %2923 }
 0x9c7   : > { %3740 = vrsqrt.f32 %v2927_v33  ;;  %v2926_v4 = vmul.f32 0.03125, %v2924_v2 }
 0x9c9   : > { %v2928_v5 = vadd.f32 1e-05, %v2926_v4 }
 0x9cb   : > { %3742 = vrsqrt.f32 %v2928_v5 }
 0x9d4   : > { %v3741_v6 = vpop.eup %3740 }
 0x9d5   : > { %v2931_v56 = vmul.f32 %v3741_v6, %v2915_v35 }
 0x9d7   : > { %v2939_v11 = vmul.f32 %v3413_v57, %v2931_v56 }
 0x9d8   : > { %v3743_v8 = vpop.eup %3742 }
 0x9d9   : > { %v2932_v9 = vmul.f32 %v3743_v8, %v2916_v59  ;;  %v2947_v18 = vadd.f32 %v3414_v12, %v2939_v11 }
 0x9db   : > { %v2940_v14 = vmul.f32 %v3413_v57, %v2932_v9 }
 0x9dd   : > { %v2948_v19 = vadd.f32 %v3414_v12, %v2940_v14 }
 0x9df   : > { %v2949_v27 = vpack.c.bf16 %v2948_v19, %v2947_v18 }
 0x9e1   : > { %3599 = vmatmul.mubr.msk.bf16.vlgmr.msra.gmra.mxu0 %vm728_vm2, %v2949_v27 }
 0xaa1   : > { %v3010_v28 = vpop.f32.mrf.mxu0 }
 0xaa2   : > { %v3011_v0 = vadd.f32 %v3415_v37, %v3010_v28 }
 0xaa3   : > { %v3600_v29 = vpop.f32.mrf.mxu0 }
 0xaa4   : > { %v3017_v32 = vmax.f32 %v3011_v0, 0.0 }
 0xaa5   : > { %v3013_v31 = vpop.f32.mrf.mxu0 }
 0xaa6   : > { %v3014_v30 = vadd.f32 %v3415_v37, %v3013_v31 }
 0xaa7   : > { %v3601_v10 = vpop.f32.mrf.mxu0 }
 0xaa8   : > { %v3018_v16 = vmax.f32 %v3014_v30, 0.0 }
 0xaaa   : > { %v3019_v23 = vpack.c.bf16 %v3018_v16, %v3017_v32 }
 0xaac   : > { %3611 = vmatmul.mubr.msk.bf16.vlgmr.msra.gmra.mxu1 %vm3059_vm7, %v3019_v23 }
 0xb6c   : > { %v3097_v24 = vpop.f32.mrf.mxu1 }
 0xb6d   : > { %v3098_v15 = vadd.f32 %v3419_v3, %v3097_v24 }
 0xb6e   : > { %v3612_v1 = vpop.f32.mrf.mxu1 }
 0xb6f   : > { %v3104_v36 = vadd.f32 %v3098_v15, %v2947_v18 }
 0xb70   : > { %v3100_v38 = vpop.f32.mrf.mxu1 }
 0xb71   : > { %v3101_v41 = vadd.f32 %v3419_v3, %v3100_v38  ;;  %v3108_v43 = vsel %vm728_vm2, %v3104_v36, 0.0 }
 0xb72   : > { %3109 = vadd.xlane.f32.xlu0 %v3108_v43  ;;  %v3613_v25 = vpop.f32.mrf.mxu1 }
 0xb73   : > { %v3105_v26 = vadd.f32 %v3101_v41, %v2948_v19 }
 0xb75   : > { %v3111_v17 = vsel %vm728_vm2, %v3105_v26, 0.0 }
 0xb76   : > { %3112 = vadd.xlane.f32.xlu1 %v3111_v17 }
 0xbfb   : > { %v3110_v44 = vpop.xlane.xlu0 %3109 }
 0xbfc   : > { %v3114_v45 = vmul.f32 0.03125, %v3110_v44 }
 0xbfe   : > { %v3116_v46 = vsub.f32 %v3104_v36, %v3114_v45 }
 0xbff   : > { %v3113_v47 = vpop.xlane.xlu1 %3112 }
 0xc00   : > { %v3115_v48 = vmul.f32 0.03125, %v3113_v47  ;;  %v3118_v49 = vmul.f32 %v3116_v46, %v3116_v46 }
 0xc02   : > { %v3117_v34 = vsub.f32 %v3105_v26, %v3115_v48  ;;  %v3120_v50 = vsel %vm728_vm2, %v3118_v49, 0.0 }
 0xc03   : > { %3121 = vadd.xlane.f32.xlu0 %v3120_v50 }
 0xc04   : > { %v3119_v51 = vmul.f32 %v3117_v34, %v3117_v34 }
 0xc06   : > { %v3123_v52 = vsel %vm728_vm2, %v3119_v51, 0.0 }
 0xc07   : > { %3124 = vadd.xlane.f32.xlu1 %v3123_v52 }
 0xc8c   : > { %v3122_v53 = vpop.xlane.xlu0 %3121 }
 0xc8d   : > { %v3126_v54 = vmul.f32 0.03125, %v3122_v53 }
 0xc8f   : > { %v3128_v35 = vadd.f32 1e-05, %v3126_v54 }
 0xc90   : > { %v3125_v55 = vpop.xlane.xlu1 %3124 }
 0xc91   : > { %3744 = vrsqrt.f32 %v3128_v35  ;;  %v3127_v39 = vmul.f32 0.03125, %v3125_v55 }
 0xc93   : > { %v3129_v58 = vadd.f32 1e-05, %v3127_v39 }
 0xc95   : > { %3746 = vrsqrt.f32 %v3129_v58 }
 0xc9e   : > { %v3745_v59 = vpop.eup %3744 }
 0xc9f   : > { %v3132_v60 = vmul.f32 %v3745_v59, %v3116_v46 }
 0xca1   : > { %v3140_v61 = vmul.f32 %v3425_v13, %v3132_v60 }
 0xca2   : > { %v3747_v62 = vpop.eup %3746 }
 0xca3   : > { %v3148_v63 = vadd.f32 %v3426_v7, %v3140_v61  ;;  %v3133_v40 = vmul.f32 %v3747_v62, %v3117_v34 }
 0xca5   : > { %3150 = vst.msk [vmem:[#allocation2] sm:$0xff] %vm728_vm2, %v3148_v63  ;;  %v3141_v42 = vmul.f32 %v3425_v13, %v3133_v40  ;;  %3155 = sbr.rel (%p3427_p4) target bundleno = 3243 (0xcab), region = 92 }
 0xca7   : > { %v3149_v33 = vadd.f32 %v3426_v7, %v3141_v42 }
 0xca9   : > { %3151 = vst.msk [vmem:[#allocation2 + $0x8] sm:$0xff] %vm728_vm2, %v3149_v33 }
 0xcaa   : > { %3156 = vst.msk [vmem:[#allocation8] sm:$0xff] %vm728_vm2, %v3148_v63  ;;  %3157 = vst.msk [vmem:[#allocation8 + $0x8] sm:$0xff] %vm728_vm2, %v3149_v33 }
 0xcab PF: > { %s4594_s30 = sld [smem:[#allocation13_spill]]  ;;  %s3880_s21 = smov [#allocation8]  }
 0xcac   : > { %s3167_s4 = sshll.u32 %s3880_s21, 4  ;;  %s3168_s4 = int_to_ptr.vmem [resolvable:$true] %s3167_s4 }
 0xcad   : > { %s3802_s22 = scalar_lea.vmem %s3168_s4, 256  ;;  %p3809_p1 = scmp.lt.s32.totalorder %s3168_s4, %s3168_s4 }
 0xcae   : > { %p3803_p12 = scmp.ne.s32.totalorder %s3168_s4, %s3802_s22  ;;  %p3810_p2 = scmp.lt.s32.totalorder %s3802_s22, %s3802_s22 }
 0xcb0   : > { %p3811_p5 = por %p3810_p2, %p3809_p1 }
 0xcb1   : > { %s4595_s14 = sadd.s32 4294967295, %s4594_s30  }
 0xcb2   : > { %p4532_p6 = scmp.eq.s32.totalorder %s4595_s14, 1 }
 0xcb4   : > { %p3804_p13 = pnand %p3803_p12, %p4532_p6 }
 0xcb6   : > { %p3805_p0 = pneg %p3804_p13 }
 0xcb8   : > { %p3812_p8 = pnand %p3811_p5, %p3805_p0 }
 0xcba   : > { %3815 = shalt.err (!%p3812_p8)
}
 0xcbb   : > { %s3881_s29 = smov 128   ;;  %s4597_s26 = sld [smem:[#allocation19_spill]] }
 0xcc1   : > { %3623 = dma.vmem_to_hbm [thread:$0]  (%p4532_p6), %s3168_s4, 256, %s4597_s26, [#allocation5], %s3881_s29, %s3881_s29, %s3878_s1  }
 0xcc2   : > { %3847 = dma.done.wait (%p4532_p6), [#allocation5], 256  }
 0xcc3   : > { %3849 = vsyncadd (%p4532_p6), [#allocation5], 4294967040 }
 0xcc4 PF: > { %s4598_s27 = sld [smem:[#allocation13_spill]] }
 0xcc5   : > { %s4599_s29 = sld [smem:[#allocation12_spill]] }
 0xcc6   : > { %s4600_s30 = sld [smem:[#allocation14_spill]] }
 0xcca   : > { %s27_s15 = sadd.s32 1, %s4598_s27  }
 0xccb   : > { %p24_p9 = scmp.ge.s32.totalorder %s27_s15, 4  }
 0xccd   :  { %26 = sbr.rel (!%p24_p9) target bundleno = 10 (0xa), region = 157 }
 0xcd2   :  { %3183 = vsyncpa [#allocation4], 1 }
 0xcd3   :  { %3185 = vsyncpa [#allocation4 + $0x1], 1 }
 0xcd4   :  { %3186 = vsyncpa [#allocation7], 1 }
 0xcd5   :  { %3187 = vsyncpa [#allocation5], 1 }
 0xcd6   :  { %3189 = vsyncpa [#allocation5 + $0x1], 1 }

</bundles_post_ra>
